<compile_context>
chip_gen: v7x
topology: tpu7x:2x2x1
jax: 0.10.0
libtpu: 0.0.40
codegen_flags: <defaults>
</compile_context>

<pallas_src>
import jax
import jax.numpy as jnp
from jax.experimental import pallas as pl
from jax.experimental.pallas import tpu as pltpu

LANE = 128          # lane width / padding quantum
TM_MAX = 512        # max node-row tile
TK_MAX = 2048       # max A_hat contraction (column) tile

_VMEM_LIMIT = 48 * 1024 * 1024  # v7x-safe (64 MiB/TC), plenty on v5e/v6e


def _round_up(v, m):
    return ((v + m - 1) // m) * m


def _choose_tile(n_pad, t_max):
    """Largest multiple of LANE that is <= t_max and divides n_pad."""
    t = min(t_max, n_pad)
    while n_pad % t != 0:
        t -= LANE
    return t


def padded_num_nodes(n):
    return _round_up(max(n, LANE), LANE)


def _pad2(a, rows, cols):
    return jnp.pad(a, ((0, rows - a.shape[0]), (0, cols - a.shape[1])))


# ---------------------------------------------------------------------------
# Pass 1: H = row_normalize(x @ W1 + b1);  M1 = H @ Wg1          (row-tiled)
# ---------------------------------------------------------------------------
def embed_kernel(x_ref, w1_ref, b1_ref, wg1_ref, m1_ref):
    h = jnp.dot(x_ref[...], w1_ref[...], preferred_element_type=jnp.float32)
    h = h + b1_ref[...]
    # Padded columns are exactly zero, so the norm over the padded width equals
    # the norm over the real emb_dim. (No eps, to match the reference; an
    # all-zero row of x @ W1 + b1 yields Inf/NaN in both.)
    inv_norm = jax.lax.rsqrt(jnp.sum(h * h, axis=-1, keepdims=True))
    h = h * inv_norm
    m1 = jnp.dot(h, wg1_ref[...], preferred_element_type=jnp.float32)
    m1_ref[...] = m1.astype(m1_ref.dtype)


# ---------------------------------------------------------------------------
# Pass 2: H1 = relu(A_hat @ M1 + bg1);  M2 = H1 @ Wg2     (row x K tiled A)
#   A_hat tile streamed (TM, TK) bf16; M1 fully VMEM-resident (n_pad, e_pad).
# ---------------------------------------------------------------------------
def gcn1_kernel(a_ref, m1_ref, bg1_ref, wg2_ref, m2_ref, acc_ref):
    k = pl.program_id(1)
    tk = a_ref.shape[1]

    @pl.when(k == 0)
    def _():
        acc_ref[...] = jnp.zeros_like(acc_ref)

    start = pl.multiple_of(k * tk, tk)
    # M1 is stored f32; cast just the (tk, e_pad) slice to bf16 so the big
    # matmul runs on the native bf16 MXU path with f32 accumulation.
    m1_blk = m1_ref[pl.ds(start, tk), :].astype(jnp.bfloat16)
    acc_ref[...] += jnp.dot(a_ref[...], m1_blk,
                            preferred_element_type=jnp.float32)

    @pl.when(k == pl.num_programs(1) - 1)
    def _():
        h1 = jnp.maximum(acc_ref[...] + bg1_ref[...], 0.0)        # f32
        m2 = jnp.dot(h1, wg2_ref[...], preferred_element_type=jnp.float32)
        m2_ref[...] = m2.astype(m2_ref.dtype)


# ---------------------------------------------------------------------------
# Pass 3: H2 = A_hat @ M2 + bg2; R = H2 @ W2 + b2; err = sum((x-R)^2, -1)
#   A_hat tile streamed (TM, TK) bf16; M2 fully VMEM-resident (n_pad, e_pad).
# ---------------------------------------------------------------------------
def gcn2_err_kernel(a_ref, m2_ref, bg2_ref, w2_ref, b2_ref, x_ref,
                    err_ref, acc_ref):
    k = pl.program_id(1)
    tk = a_ref.shape[1]

    @pl.when(k == 0)
    def _():
        acc_ref[...] = jnp.zeros_like(acc_ref)

    start = pl.multiple_of(k * tk, tk)
    m2_blk = m2_ref[pl.ds(start, tk), :].astype(jnp.bfloat16)
    acc_ref[...] += jnp.dot(a_ref[...], m2_blk,
                            preferred_element_type=jnp.float32)

    @pl.when(k == pl.num_programs(1) - 1)
    def _():
        h2 = acc_ref[...] + bg2_ref[...]                          # f32
        r = jnp.dot(h2, w2_ref[...], preferred_element_type=jnp.float32)
        r = r + b2_ref[...]
        d = x_ref[...] - r                                        # (TM, Dp) f32
        dd = d * d
        # MXU NT contraction (flash-attention style dimension numbers):
        # ones(8, Dp) x dd(TM, Dp)^T -> (8, TM); all rows identical, keep row 0.
        # Writes the per-row errors lane-dense without an XLU transpose.
        ones_rows = jnp.ones((8, dd.shape[-1]), jnp.float32)
        res = jax.lax.dot_general(
            ones_rows, dd,
            dimension_numbers=(((1,), (1,)), ((), ())),
            preferred_element_type=jnp.float32)
        err_ref[...] = res[0:1, :]


# ---------------------------------------------------------------------------
# Glue: sparse edge_index -> dense symmetric-normalized adjacency
#   Fused build + normalize + pad + cast (single O(N^2) pass).
# ---------------------------------------------------------------------------
def build_normalized_adjacency(edge_index, num_nodes, n_pad=None,
                               dtype=jnp.float32):
    """A_hat = D^-1/2 (A + I) D^-1/2, dense (n_pad, n_pad) in `dtype`."""
    if n_pad is None:
        n_pad = num_nodes
    src, dst = edge_index[0], edge_index[1]
    adj = jnp.zeros((n_pad, n_pad), jnp.float32).at[dst, src].set(1.0)
    idx = jnp.arange(num_nodes)
    adj = adj.at[idx, idx].set(1.0)  # self loops (real nodes only)
    deg = jnp.sum(adj, axis=1)
    dinv = 1.0 / jnp.sqrt(jnp.maximum(deg, 1.0))
    return (adj * dinv[:, None] * dinv[None, :]).astype(dtype)


# ---------------------------------------------------------------------------
# Kernel pipeline (expects a pre-built, padded, bf16 A_hat)
# ---------------------------------------------------------------------------
def recon_kernels(x, a_hat, params):
    n, din = x.shape
    emb = params["w1"].shape[1]
    n_pad = a_hat.shape[0]
    assert a_hat.shape == (n_pad, n_pad)
    assert n_pad % LANE == 0 and n_pad >= n

    tm = _choose_tile(n_pad, TM_MAX)
    tk = _choose_tile(n_pad, TK_MAX)
    din_pad = _round_up(din, LANE)
    e_pad = _round_up(emb, LANE)
    nm = n_pad // tm
    nk = n_pad // tk

    x_p = _pad2(x, n_pad, din_pad)
    w1 = _pad2(params["w1"], din_pad, e_pad)
    b1 = _pad2(params["b1"], 1, e_pad)
    wg1 = _pad2(params["wg1"], e_pad, e_pad)
    bg1 = _pad2(params["bg1"], 1, e_pad)
    wg2 = _pad2(params["wg2"], e_pad, e_pad)
    bg2 = _pad2(params["bg2"], 1, e_pad)
    w2 = _pad2(params["w2"], e_pad, din_pad)
    b2 = _pad2(params["b2"], 1, din_pad)

    cparams_rows = pltpu.CompilerParams(
        dimension_semantics=("parallel",),
        vmem_limit_bytes=_VMEM_LIMIT)
    cparams_rows_k = pltpu.CompilerParams(
        dimension_semantics=("parallel", "arbitrary"),
        vmem_limit_bytes=_VMEM_LIMIT)

    # -- pass 1: M1 = row_normalize(x @ W1 + b1) @ Wg1 (f32) ------------------
    m1 = pl.pallas_call(
        embed_kernel,
        out_shape=jax.ShapeDtypeStruct((n_pad, e_pad), jnp.float32),
        grid_spec=pltpu.PrefetchScalarGridSpec(
            num_scalar_prefetch=0,
            grid=(nm,),
            in_specs=[
                pl.BlockSpec((tm, din_pad), lambda i: (i, 0)),       # x
                pl.BlockSpec((din_pad, e_pad), lambda i: (0, 0)),    # W1 (resident)
                pl.BlockSpec((1, e_pad), lambda i: (0, 0)),          # b1
                pl.BlockSpec((e_pad, e_pad), lambda i: (0, 0)),      # Wg1
            ],
            out_specs=pl.BlockSpec((tm, e_pad), lambda i: (i, 0)),
        ),
        compiler_params=cparams_rows,
    )(x_p, w1, b1, wg1)

    # -- pass 2: M2 = relu(A_hat @ M1 + bg1) @ Wg2 ----------------------------
    m2 = pl.pallas_call(
        gcn1_kernel,
        out_shape=jax.ShapeDtypeStruct((n_pad, e_pad), jnp.float32),
        grid_spec=pltpu.PrefetchScalarGridSpec(
            num_scalar_prefetch=0,
            grid=(nm, nk),
            in_specs=[
                pl.BlockSpec((tm, tk), lambda i, k: (i, k)),         # A_hat tile
                pl.BlockSpec((n_pad, e_pad), lambda i, k: (0, 0)),   # M1 (VMEM-resident)
                pl.BlockSpec((1, e_pad), lambda i, k: (0, 0)),       # bg1 (resident)
                pl.BlockSpec((e_pad, e_pad), lambda i, k: (0, 0)),   # Wg2 (resident)
            ],
            out_specs=pl.BlockSpec((tm, e_pad), lambda i, k: (i, 0)),
            scratch_shapes=[pltpu.VMEM((tm, e_pad), jnp.float32)],
        ),
        compiler_params=cparams_rows_k,
    )(a_hat, m1, bg1, wg2)

    # -- pass 3: H2 = A_hat @ M2 + bg2; R = H2 @ W2 + b2; per-row sq. error ---
    err = pl.pallas_call(
        gcn2_err_kernel,
        out_shape=jax.ShapeDtypeStruct((1, n_pad), jnp.float32),
        grid_spec=pltpu.PrefetchScalarGridSpec(
            num_scalar_prefetch=0,
            grid=(nm, nk),
            in_specs=[
                pl.BlockSpec((tm, tk), lambda i, k: (i, k)),         # A_hat tile
                pl.BlockSpec((n_pad, e_pad), lambda i, k: (0, 0)),   # M2 (VMEM-resident)
                pl.BlockSpec((1, e_pad), lambda i, k: (0, 0)),       # bg2 (resident)
                pl.BlockSpec((e_pad, din_pad), lambda i, k: (0, 0)), # W2 (resident)
                pl.BlockSpec((1, din_pad), lambda i, k: (0, 0)),     # b2 (resident)
                pl.BlockSpec((tm, din_pad), lambda i, k: (i, 0)),    # x tile
            ],
            out_specs=pl.BlockSpec((1, tm), lambda i, k: (0, i)),    # lane-dense
            scratch_shapes=[pltpu.VMEM((tm, e_pad), jnp.float32)],
        ),
        compiler_params=cparams_rows_k,
    )(a_hat, m2, bg2, w2, b2, x_p)

    return err[0, :n]


# ---------------------------------------------------------------------------
# Convenience wrapper (builds A_hat each call). For static graphs, prefer
# hoisting build_normalized_adjacency(...) and calling recon_kernels directly
# (as done in __main__) to amortize the O(N^2) preprocessing.
# ---------------------------------------------------------------------------
def recon_forward(x, edge_index, params):
    n = x.shape[0]
    n_pad = padded_num_nodes(n)
    a_hat = build_normalized_adjacency(edge_index, n, n_pad=n_pad,
                                       dtype=jnp.bfloat16)
    return recon_kernels(x, a_hat, params)


# ---------------------------------------------------------------------------
# Params + pure-JAX reference (PyTorch semantics, all f32)
# ---------------------------------------------------------------------------
def init_params(key, input_dim, emb_dim):
    ks = jax.random.split(key, 8)
    s_in = 1.0 / jnp.sqrt(input_dim)
    s_emb = 1.0 / jnp.sqrt(emb_dim)
    return {
        "w1": jax.random.uniform(ks[0], (input_dim, emb_dim), jnp.float32, -s_in, s_in),
        "b1": jax.random.uniform(ks[1], (1, emb_dim), jnp.float32, -s_in, s_in),
        "wg1": jax.random.uniform(ks[2], (emb_dim, emb_dim), jnp.float32, -s_emb, s_emb),
        "bg1": jax.random.uniform(ks[3], (1, emb_dim), jnp.float32, -s_emb, s_emb),
        "wg2": jax.random.uniform(ks[4], (emb_dim, emb_dim), jnp.float32, -s_emb, s_emb),
        "bg2": jax.random.uniform(ks[5], (1, emb_dim), jnp.float32, -s_emb, s_emb),
        "w2": jax.random.uniform(ks[6], (emb_dim, input_dim), jnp.float32, -s_emb, s_emb),
        "b2": jax.random.uniform(ks[7], (1, input_dim), jnp.float32, -s_emb, s_emb),
    }


def recon_reference(x, edge_index, params):
    a_hat = build_normalized_adjacency(edge_index, x.shape[0])
    h = x @ params["w1"] + params["b1"]
    h = h / jnp.linalg.norm(h, axis=-1).reshape(-1, 1)
    h1 = jnp.maximum(a_hat @ (h @ params["wg1"]) + params["bg1"], 0.0)
    h2 = a_hat @ (h1 @ params["wg2"]) + params["bg2"]
    r = h2 @ params["w2"] + params["b2"]
    return jnp.sum(jnp.square(x - r), axis=-1)


if __name__ == "__main__":
    key = jax.random.PRNGKey(0)
    k_x, k_p = jax.random.split(key)

    num_nodes, input_dim, emb_dim = 256, 16, 32
    x = jax.random.normal(k_x, (num_nodes, input_dim), jnp.float32)

    # bidirectional ring graph
    src = jnp.arange(num_nodes, dtype=jnp.int32)
    dst = (src + 1) % num_nodes
    edge_index = jnp.stack([jnp.concatenate([src, dst]),
                            jnp.concatenate([dst, src])], axis=0)

    params = init_params(k_p, input_dim, emb_dim)

    # Static graph: hoist the fused A_hat build/normalize/pad/bf16-cast out of
    # the jitted forward so the O(N^2) preprocessing is amortized across calls.
    n_pad = padded_num_nodes(num_nodes)
    a_hat = build_normalized_adjacency(edge_index, num_nodes, n_pad=n_pad,
                                       dtype=jnp.bfloat16)
    a_hat = jax.block_until_ready(a_hat)

    fwd = jax.jit(recon_kernels)
    out = fwd(x, a_hat, params)
    jax.block_until_ready(out)

    ref = recon_reference(x, edge_index, params)
    assert out.shape == (num_nodes,)
    # A_hat is bf16 on the GCN path (f32 accumulation; f32 M1/M2/lin/lin2).
    assert jnp.allclose(out, ref, atol=1e-2, rtol=1e-2), (
        "max abs diff = %f" % float(jnp.max(jnp.abs(out - ref))))

    print("KERNEL_OK")
</pallas_src>

<mosaic_0001>
module attributes {stable_mosaic.version = 11 : i64} {
  func.func @embed_kernel(%arg0: i32, %arg1: memref<256x128xf32, #tpu.memory_space<vmem>>, %arg2: memref<128x128xf32, #tpu.memory_space<vmem>>, %arg3: memref<1x128xf32, #tpu.memory_space<vmem>>, %arg4: memref<128x128xf32, #tpu.memory_space<vmem>>, %arg5: memref<256x128xf32, #tpu.memory_space<vmem>>) attributes {dimension_semantics = [#tpu.dimension_semantics<parallel>], iteration_bounds = array<i64: 1>, scalar_prefetch = 0 : i64, scratch_operands = 0 : i64, tpu.core_type = #tpu.core_type<tc>, window_params = [{transform_indices = @transform_0, window_bounds = array<i64: 256, 128>}, {pipeline_mode = #tpu.pipeline_mode<synchronous>, transform_indices = @transform_1, window_bounds = array<i64: 128, 128>}, {pipeline_mode = #tpu.pipeline_mode<synchronous>, transform_indices = @transform_2, window_bounds = array<i64: 1, 128>}, {pipeline_mode = #tpu.pipeline_mode<synchronous>, transform_indices = @transform_3, window_bounds = array<i64: 128, 128>}, {transform_indices = @transform_4, window_bounds = array<i64: 256, 128>}]} {
    %c0 = arith.constant 0 : index
    %c0_0 = arith.constant 0 : index
    %0 = vector.load %arg1[%c0, %c0_0] : memref<256x128xf32, #tpu.memory_space<vmem>>, vector<256x128xf32>
    %c0_1 = arith.constant 0 : index
    %c0_2 = arith.constant 0 : index
    %1 = vector.load %arg2[%c0_1, %c0_2] : memref<128x128xf32, #tpu.memory_space<vmem>>, vector<128x128xf32>
    %cst = arith.constant dense<0.000000e+00> : vector<256x128xf32>
    %2 = tpu.matmul %0, %1, %cst {dimension_numbers = #tpu.dot_dimension_numbers<[1], [0], [0], [1], [0, 0, 1, 1], [], []>} : vector<256x128xf32>, vector<128x128xf32>, vector<256x128xf32> -> vector<256x128xf32>
    %c0_3 = arith.constant 0 : index
    %c0_4 = arith.constant 0 : index
    %3 = vector.load %arg3[%c0_3, %c0_4] : memref<1x128xf32, #tpu.memory_space<vmem>>, vector<1x128xf32>
    %4 = vector.broadcast %3 : vector<1x128xf32> to vector<256x128xf32>
    %5 = arith.addf %2, %4 : vector<256x128xf32>
    %6 = arith.mulf %5, %5 : vector<256x128xf32>
    %cst_5 = arith.constant dense<0.000000e+00> : vector<256xf32>
    %7 = vector.multi_reduction <add>, %6, %cst_5 [1] : vector<256x128xf32> to vector<256xf32>
    %8 = vector.shape_cast %7 : vector<256xf32> to vector<256x1xf32>
    %9 = math.rsqrt %8 : vector<256x1xf32>
    %10 = vector.broadcast %9 : vector<256x1xf32> to vector<256x128xf32>
    %11 = arith.mulf %5, %10 : vector<256x128xf32>
    %c0_6 = arith.constant 0 : index
    %c0_7 = arith.constant 0 : index
    %12 = vector.load %arg4[%c0_6, %c0_7] : memref<128x128xf32, #tpu.memory_space<vmem>>, vector<128x128xf32>
    %cst_8 = arith.constant dense<0.000000e+00> : vector<256x128xf32>
    %13 = tpu.matmul %11, %12, %cst_8 {dimension_numbers = #tpu.dot_dimension_numbers<[1], [0], [0], [1], [0, 0, 1, 1], [], []>} : vector<256x128xf32>, vector<128x128xf32>, vector<256x128xf32> -> vector<256x128xf32>
    %c0_9 = arith.constant 0 : index
    %c0_10 = arith.constant 0 : index
    %14 = vector.load %arg5[%c0_9, %c0_10] : memref<256x128xf32, #tpu.memory_space<vmem>>, vector<256x128xf32>
    tpu.vector_store %arg5[%c0_9, %c0_10], %13 {strides = array<i32>} : memref<256x128xf32, #tpu.memory_space<vmem>>, vector<256x128xf32>,
    return
  }
  func.func @transform_0(%arg0: i32) -> (i32, i32) {
    %c0_i32 = arith.constant 0 : i32
    %c0_i32_0 = arith.constant 0 : i32
    return %arg0, %c0_i32 : i32, i32
  }
  func.func @transform_1(%arg0: i32) -> (i32, i32) {
    %c0_i32 = arith.constant 0 : i32
    %c0_i32_0 = arith.constant 0 : i32
    %c0_i32_1 = arith.constant 0 : i32
    return %c0_i32, %c0_i32_0 : i32, i32
  }
  func.func @transform_2(%arg0: i32) -> (i32, i32) {
    %c0_i32 = arith.constant 0 : i32
    %c0_i32_0 = arith.constant 0 : i32
    %c0_i32_1 = arith.constant 0 : i32
    return %c0_i32, %c0_i32_0 : i32, i32
  }
  func.func @transform_3(%arg0: i32) -> (i32, i32) {
    %c0_i32 = arith.constant 0 : i32
    %c0_i32_0 = arith.constant 0 : i32
    %c0_i32_1 = arith.constant 0 : i32
    return %c0_i32, %c0_i32_0 : i32, i32
  }
  func.func @transform_4(%arg0: i32) -> (i32, i32) {
    %c0_i32 = arith.constant 0 : i32
    %c0_i32_0 = arith.constant 0 : i32
    return %arg0, %c0_i32 : i32, i32
  }
}

module attributes {stable_mosaic.version = 11 : i64} {
  func.func @gcn1_kernel(%arg0: i32, %arg1: i32, %arg2: memref<256x256xbf16, #tpu.memory_space<vmem>>, %arg3: memref<256x128xf32, #tpu.memory_space<vmem>>, %arg4: memref<1x128xf32, #tpu.memory_space<vmem>>, %arg5: memref<128x128xf32, #tpu.memory_space<vmem>>, %arg6: memref<256x128xf32, #tpu.memory_space<vmem>>, %arg7: memref<256x128xf32, #tpu.memory_space<vmem>>) attributes {dimension_semantics = [#tpu.dimension_semantics<parallel>, #tpu.dimension_semantics<arbitrary>], iteration_bounds = array<i64: 1, 1>, scalar_prefetch = 0 : i64, scratch_operands = 1 : i64, tpu.core_type = #tpu.core_type<tc>, window_params = [{transform_indices = @transform_0, window_bounds = array<i64: 256, 256>}, {pipeline_mode = #tpu.pipeline_mode<synchronous>, transform_indices = @transform_1, window_bounds = array<i64: 256, 128>}, {pipeline_mode = #tpu.pipeline_mode<synchronous>, transform_indices = @transform_2, window_bounds = array<i64: 1, 128>}, {pipeline_mode = #tpu.pipeline_mode<synchronous>, transform_indices = @transform_3, window_bounds = array<i64: 128, 128>}, {transform_indices = @transform_4, window_bounds = array<i64: 256, 128>}]} {
    %c0_i32 = arith.constant 0 : i32
    %0 = arith.cmpi eq, %arg1, %c0_i32 : i32
    %1 = arith.extui %0 : i1 to i32
    %c0_i32_0 = arith.constant 0 : i32
    %2 = arith.cmpi ne, %1, %c0_i32_0 : i32
    scf.if %2 {
      %cst_9 = arith.constant 0.000000e+00 : f32
      %16 = vector.broadcast %cst_9 : f32 to vector<256x128xf32>
      %c0_10 = arith.constant 0 : index
      %c0_11 = arith.constant 0 : index
      %17 = vector.load %arg7[%c0_10, %c0_11] : memref<256x128xf32, #tpu.memory_space<vmem>>, vector<256x128xf32>
      tpu.vector_store %arg7[%c0_10, %c0_11], %16 {strides = array<i32>} : memref<256x128xf32, #tpu.memory_space<vmem>>, vector<256x128xf32>,
    } else {
    }
    %c256_i32 = arith.constant 256 : i32
    %3 = arith.muli %arg1, %c256_i32 : i32
    %4 = tpu.assume_multiple %3, 256 : i32
    %5 = arith.index_cast %4 : i32 to index
    %c0 = arith.constant 0 : index
    %6 = vector.load %arg3[%5, %c0] : memref<256x128xf32, #tpu.memory_space<vmem>>, vector<256x128xf32>
    %7 = arith.truncf %6 : vector<256x128xf32> to vector<256x128xbf16>
    %c0_1 = arith.constant 0 : index
    %c0_2 = arith.constant 0 : index
    %8 = vector.load %arg7[%c0_1, %c0_2] : memref<256x128xf32, #tpu.memory_space<vmem>>, vector<256x128xf32>
    %c0_3 = arith.constant 0 : index
    %c0_4 = arith.constant 0 : index
    %9 = vector.load %arg2[%c0_3, %c0_4] : memref<256x256xbf16, #tpu.memory_space<vmem>>, vector<256x256xbf16>
    %cst = arith.constant dense<0.000000e+00> : vector<256x128xf32>
    %10 = tpu.matmul %9, %7, %cst {dimension_numbers = #tpu.dot_dimension_numbers<[1], [0], [0], [1], [0, 0, 1, 1], [], []>} : vector<256x256xbf16>, vector<256x128xbf16>, vector<256x128xf32> -> vector<256x128xf32>
    %11 = arith.addf %8, %10 : vector<256x128xf32>
    %c0_5 = arith.constant 0 : index
    %c0_6 = arith.constant 0 : index
    %12 = vector.load %arg7[%c0_5, %c0_6] : memref<256x128xf32, #tpu.memory_space<vmem>>, vector<256x128xf32>
    tpu.vector_store %arg7[%c0_5, %c0_6], %11 {strides = array<i32>} : memref<256x128xf32, #tpu.memory_space<vmem>>, vector<256x128xf32>,
    %c0_i32_7 = arith.constant 0 : i32
    %13 = arith.cmpi eq, %arg1, %c0_i32_7 : i32
    %14 = arith.extui %13 : i1 to i32
    %c0_i32_8 = arith.constant 0 : i32
    %15 = arith.cmpi ne, %14, %c0_i32_8 : i32
    scf.if %15 {
      %c0_9 = arith.constant 0 : index
      %c0_10 = arith.constant 0 : index
      %16 = vector.load %arg7[%c0_9, %c0_10] : memref<256x128xf32, #tpu.memory_space<vmem>>, vector<256x128xf32>
      %c0_11 = arith.constant 0 : index
      %c0_12 = arith.constant 0 : index
      %17 = vector.load %arg4[%c0_11, %c0_12] : memref<1x128xf32, #tpu.memory_space<vmem>>, vector<1x128xf32>
      %18 = vector.broadcast %17 : vector<1x128xf32> to vector<256x128xf32>
      %19 = arith.addf %16, %18 : vector<256x128xf32>
      %cst_13 = arith.constant 0.000000e+00 : f32
      %20 = vector.broadcast %cst_13 : f32 to vector<256x128xf32>
      %21 = arith.maximumf %19, %20 : vector<256x128xf32>
      %c0_14 = arith.constant 0 : index
      %c0_15 = arith.constant 0 : index
      %22 = vector.load %arg5[%c0_14, %c0_15] : memref<128x128xf32, #tpu.memory_space<vmem>>, vector<128x128xf32>
      %cst_16 = arith.constant dense<0.000000e+00> : vector<256x128xf32>
      %23 = tpu.matmul %21, %22, %cst_16 {dimension_numbers = #tpu.dot_dimension_numbers<[1], [0], [0], [1], [0, 0, 1, 1], [], []>} : vector<256x128xf32>, vector<128x128xf32>, vector<256x128xf32> -> vector<256x128xf32>
      %c0_17 = arith.constant 0 : index
      %c0_18 = arith.constant 0 : index
      %24 = vector.load %arg6[%c0_17, %c0_18] : memref<256x128xf32, #tpu.memory_space<vmem>>, vector<256x128xf32>
      tpu.vector_store %arg6[%c0_17, %c0_18], %23 {strides = array<i32>} : memref<256x128xf32, #tpu.memory_space<vmem>>, vector<256x128xf32>,
    } else {
    }
    return
  }
  func.func @transform_0(%arg0: i32, %arg1: i32) -> (i32, i32) {
    %c0_i32 = arith.constant 0 : i32
    return %arg0, %arg1 : i32, i32
  }
  func.func @transform_1(%arg0: i32, %arg1: i32) -> (i32, i32) {
    %c0_i32 = arith.constant 0 : i32
    %c0_i32_0 = arith.constant 0 : i32
    %c0_i32_1 = arith.constant 0 : i32
    return %c0_i32, %c0_i32_0 : i32, i32
  }
  func.func @transform_2(%arg0: i32, %arg1: i32) -> (i32, i32) {
    %c0_i32 = arith.constant 0 : i32
    %c0_i32_0 = arith.constant 0 : i32
    %c0_i32_1 = arith.constant 0 : i32
    return %c0_i32, %c0_i32_0 : i32, i32
  }
  func.func @transform_3(%arg0: i32, %arg1: i32) -> (i32, i32) {
    %c0_i32 = arith.constant 0 : i32
    %c0_i32_0 = arith.constant 0 : i32
    %c0_i32_1 = arith.constant 0 : i32
    return %c0_i32, %c0_i32_0 : i32, i32
  }
  func.func @transform_4(%arg0: i32, %arg1: i32) -> (i32, i32) {
    %c0_i32 = arith.constant 0 : i32
    %c0_i32_0 = arith.constant 0 : i32
    return %arg0, %c0_i32 : i32, i32
  }
}

module attributes {stable_mosaic.version = 11 : i64} {
  func.func @gcn2_err_kernel(%arg0: i32, %arg1: i32, %arg2: memref<256x256xbf16, #tpu.memory_space<vmem>>, %arg3: memref<256x128xf32, #tpu.memory_space<vmem>>, %arg4: memref<1x128xf32, #tpu.memory_space<vmem>>, %arg5: memref<128x128xf32, #tpu.memory_space<vmem>>, %arg6: memref<1x128xf32, #tpu.memory_space<vmem>>, %arg7: memref<256x128xf32, #tpu.memory_space<vmem>>, %arg8: memref<1x256xf32, #tpu.memory_space<vmem>>, %arg9: memref<256x128xf32, #tpu.memory_space<vmem>>) attributes {dimension_semantics = [#tpu.dimension_semantics<parallel>, #tpu.dimension_semantics<arbitrary>], iteration_bounds = array<i64: 1, 1>, scalar_prefetch = 0 : i64, scratch_operands = 1 : i64, tpu.core_type = #tpu.core_type<tc>, window_params = [{transform_indices = @transform_0, window_bounds = array<i64: 256, 256>}, {pipeline_mode = #tpu.pipeline_mode<synchronous>, transform_indices = @transform_1, window_bounds = array<i64: 256, 128>}, {pipeline_mode = #tpu.pipeline_mode<synchronous>, transform_indices = @transform_2, window_bounds = array<i64: 1, 128>}, {pipeline_mode = #tpu.pipeline_mode<synchronous>, transform_indices = @transform_3, window_bounds = array<i64: 128, 128>}, {pipeline_mode = #tpu.pipeline_mode<synchronous>, transform_indices = @transform_4, window_bounds = array<i64: 1, 128>}, {transform_indices = @transform_5, window_bounds = array<i64: 256, 128>}, {transform_indices = @transform_6, window_bounds = array<i64: 1, 256>}]} {
    %c0_i32 = arith.constant 0 : i32
    %0 = arith.cmpi eq, %arg1, %c0_i32 : i32
    %1 = arith.extui %0 : i1 to i32
    %c0_i32_0 = arith.constant 0 : i32
    %2 = arith.cmpi ne, %1, %c0_i32_0 : i32
    scf.if %2 {
      %cst_9 = arith.constant 0.000000e+00 : f32
      %16 = vector.broadcast %cst_9 : f32 to vector<256x128xf32>
      %c0_10 = arith.constant 0 : index
      %c0_11 = arith.constant 0 : index
      %17 = vector.load %arg9[%c0_10, %c0_11] : memref<256x128xf32, #tpu.memory_space<vmem>>, vector<256x128xf32>
      tpu.vector_store %arg9[%c0_10, %c0_11], %16 {strides = array<i32>} : memref<256x128xf32, #tpu.memory_space<vmem>>, vector<256x128xf32>,
    } else {
    }
    %c256_i32 = arith.constant 256 : i32
    %3 = arith.muli %arg1, %c256_i32 : i32
    %4 = tpu.assume_multiple %3, 256 : i32
    %5 = arith.index_cast %4 : i32 to index
    %c0 = arith.constant 0 : index
    %6 = vector.load %arg3[%5, %c0] : memref<256x128xf32, #tpu.memory_space<vmem>>, vector<256x128xf32>
    %7 = arith.truncf %6 : vector<256x128xf32> to vector<256x128xbf16>
    %c0_1 = arith.constant 0 : index
    %c0_2 = arith.constant 0 : index
    %8 = vector.load %arg9[%c0_1, %c0_2] : memref<256x128xf32, #tpu.memory_space<vmem>>, vector<256x128xf32>
    %c0_3 = arith.constant 0 : index
    %c0_4 = arith.constant 0 : index
    %9 = vector.load %arg2[%c0_3, %c0_4] : memref<256x256xbf16, #tpu.memory_space<vmem>>, vector<256x256xbf16>
    %cst = arith.constant dense<0.000000e+00> : vector<256x128xf32>
    %10 = tpu.matmul %9, %7, %cst {dimension_numbers = #tpu.dot_dimension_numbers<[1], [0], [0], [1], [0, 0, 1, 1], [], []>} : vector<256x256xbf16>, vector<256x128xbf16>, vector<256x128xf32> -> vector<256x128xf32>
    %11 = arith.addf %8, %10 : vector<256x128xf32>
    %c0_5 = arith.constant 0 : index
    %c0_6 = arith.constant 0 : index
    %12 = vector.load %arg9[%c0_5, %c0_6] : memref<256x128xf32, #tpu.memory_space<vmem>>, vector<256x128xf32>
    tpu.vector_store %arg9[%c0_5, %c0_6], %11 {strides = array<i32>} : memref<256x128xf32, #tpu.memory_space<vmem>>, vector<256x128xf32>,
    %c0_i32_7 = arith.constant 0 : i32
    %13 = arith.cmpi eq, %arg1, %c0_i32_7 : i32
    %14 = arith.extui %13 : i1 to i32
    %c0_i32_8 = arith.constant 0 : i32
    %15 = arith.cmpi ne, %14, %c0_i32_8 : i32
    scf.if %15 {
      %c0_9 = arith.constant 0 : index
      %c0_10 = arith.constant 0 : index
      %16 = vector.load %arg9[%c0_9, %c0_10] : memref<256x128xf32, #tpu.memory_space<vmem>>, vector<256x128xf32>
      %c0_11 = arith.constant 0 : index
      %c0_12 = arith.constant 0 : index
      %17 = vector.load %arg4[%c0_11, %c0_12] : memref<1x128xf32, #tpu.memory_space<vmem>>, vector<1x128xf32>
      %18 = vector.broadcast %17 : vector<1x128xf32> to vector<256x128xf32>
      %19 = arith.addf %16, %18 : vector<256x128xf32>
      %c0_13 = arith.constant 0 : index
      %c0_14 = arith.constant 0 : index
      %20 = vector.load %arg5[%c0_13, %c0_14] : memref<128x128xf32, #tpu.memory_space<vmem>>, vector<128x128xf32>
      %cst_15 = arith.constant dense<0.000000e+00> : vector<256x128xf32>
      %21 = tpu.matmul %19, %20, %cst_15 {dimension_numbers = #tpu.dot_dimension_numbers<[1], [0], [0], [1], [0, 0, 1, 1], [], []>} : vector<256x128xf32>, vector<128x128xf32>, vector<256x128xf32> -> vector<256x128xf32>
      %c0_16 = arith.constant 0 : index
      %c0_17 = arith.constant 0 : index
      %22 = vector.load %arg6[%c0_16, %c0_17] : memref<1x128xf32, #tpu.memory_space<vmem>>, vector<1x128xf32>
      %23 = vector.broadcast %22 : vector<1x128xf32> to vector<256x128xf32>
      %24 = arith.addf %21, %23 : vector<256x128xf32>
      %c0_18 = arith.constant 0 : index
      %c0_19 = arith.constant 0 : index
      %25 = vector.load %arg7[%c0_18, %c0_19] : memref<256x128xf32, #tpu.memory_space<vmem>>, vector<256x128xf32>
      %26 = arith.subf %25, %24 : vector<256x128xf32>
      %27 = arith.mulf %26, %26 : vector<256x128xf32>
      %cst_20 = arith.constant 1.000000e+00 : f32
      %28 = vector.broadcast %cst_20 : f32 to vector<8x128xf32>
      %cst_21 = arith.constant dense<0.000000e+00> : vector<8x256xf32>
      %29 = tpu.matmul %28, %27, %cst_21 {dimension_numbers = #tpu.dot_dimension_numbers<[1], [1], [0], [0], [0, 0, 1, 0], [], []>} : vector<8x128xf32>, vector<256x128xf32>, vector<8x256xf32> -> vector<8x256xf32>
      %30 = vector.extract_strided_slice %29 {offsets = [0, 0], sizes = [1, 256], strides = [1, 1]} : vector<8x256xf32> to vector<1x256xf32>
      %c0_22 = arith.constant 0 : index
      %c0_23 = arith.constant 0 : index
      %31 = vector.load %arg8[%c0_22, %c0_23] : memref<1x256xf32, #tpu.memory_space<vmem>>, vector<1x256xf32>
      tpu.vector_store %arg8[%c0_22, %c0_23], %30 {strides = array<i32>} : memref<1x256xf32, #tpu.memory_space<vmem>>, vector<1x256xf32>,
    } else {
    }
    return
  }
  func.func @transform_0(%arg0: i32, %arg1: i32) -> (i32, i32) {
    %c0_i32 = arith.constant 0 : i32
    return %arg0, %arg1 : i32, i32
  }
  func.func @transform_1(%arg0: i32, %arg1: i32) -> (i32, i32) {
    %c0_i32 = arith.constant 0 : i32
    %c0_i32_0 = arith.constant 0 : i32
    %c0_i32_1 = arith.constant 0 : i32
    return %c0_i32, %c0_i32_0 : i32, i32
  }
  func.func @transform_2(%arg0: i32, %arg1: i32) -> (i32, i32) {
    %c0_i32 = arith.constant 0 : i32
    %c0_i32_0 = arith.constant 0 : i32
    %c0_i32_1 = arith.constant 0 : i32
    return %c0_i32, %c0_i32_0 : i32, i32
  }
  func.func @transform_3(%arg0: i32, %arg1: i32) -> (i32, i32) {
    %c0_i32 = arith.constant 0 : i32
    %c0_i32_0 = arith.constant 0 : i32
    %c0_i32_1 = arith.constant 0 : i32
    return %c0_i32, %c0_i32_0 : i32, i32
  }
  func.func @transform_4(%arg0: i32, %arg1: i32) -> (i32, i32) {
    %c0_i32 = arith.constant 0 : i32
    %c0_i32_0 = arith.constant 0 : i32
    %c0_i32_1 = arith.constant 0 : i32
    return %c0_i32, %c0_i32_0 : i32, i32
  }
  func.func @transform_5(%arg0: i32, %arg1: i32) -> (i32, i32) {
    %c0_i32 = arith.constant 0 : i32
    %c0_i32_0 = arith.constant 0 : i32
    return %arg0, %c0_i32 : i32, i32
  }
  func.func @transform_6(%arg0: i32, %arg1: i32) -> (i32, i32) {
    %c0_i32 = arith.constant 0 : i32
    %c0_i32_0 = arith.constant 0 : i32
    return %c0_i32, %arg0 : i32, i32
  }
}

</mosaic_0001>

<bundles_post_ra>
// kernel: recon_kernels.3
= control target key start
LH: loop header
LB: loop body
LE: loop exit
PB: predicated region body
PF: predicated region fallthrough
CT: control target
= control target key end

     0   :  { %s1629_s1 = inlined_call_operand.vmem [shape: f32[128,128], index: 1, kind: input, shape index: {}]   ;;  %s1630_s0 = inlined_call_operand.vmem [shape: f32[256,128], index: 0, kind: input, shape index: {}]   ;;  %s1631_s3 = inlined_call_operand.vmem [shape: f32[128,128], index: 3, kind: input, shape index: {}]   ;;  %s1632_s2 = inlined_call_operand.vmem [shape: f32[1,128], index: 2, kind: input, shape index: {}]   ;;  %s1633_s4 = inlined_call_operand.vmem [shape: f32[256,128], index: 4, kind: output, shape index: {}]  }
   0x1   :  { %v49_v0 = vld [vmem:[%s1629_s1] sm:$0xff]  ;;  %v50_v1 = vld [vmem:[%s1629_s1 + $0x8] sm:$0xff]  ;;  %v51_v2 = vld [vmem:[%s1629_s1 + $0x10] sm:$0xff] }
   0x2   :  { %v991_v3 = vpack.c.bf16 %v50_v1, %v49_v0  ;;  %v52_v4 = vld [vmem:[%s1629_s1 + $0x18] sm:$0xff]  ;;  %v53_v6 = vld [vmem:[%s1629_s1 + $0x20] sm:$0xff]  ;;  %v54_v7 = vld [vmem:[%s1629_s1 + $0x28] sm:$0xff] }
   0x3   :  { %v995_v5 = vpack.c.bf16 %v52_v4, %v51_v2  ;;  %v999_v8 = vpack.c.bf16 %v54_v7, %v53_v6  ;;  %v17_v9 = vld [vmem:[%s1630_s0] sm:$0xff]  ;;  %v55_v10 = vld [vmem:[%s1629_s1 + $0x30] sm:$0xff]  ;;  %v56_v11 = vld [vmem:[%s1629_s1 + $0x38] sm:$0xff] }
   0x4   :  { %992 = vmatprep.subr.bf16.mxu0 %v991_v3  ;;  %863 = vmatprep.mubr.f32.mxu0 %v17_v9  ;;  %v1003_v12 = vpack.c.bf16 %v56_v11, %v55_v10  ;;  %v57_v13 = vld [vmem:[%s1629_s1 + $0x40] sm:$0xff]  ;;  %v58_v14 = vld [vmem:[%s1629_s1 + $0x48] sm:$0xff]  ;;  %v59_v16 = vld [vmem:[%s1629_s1 + $0x50] sm:$0xff] }
   0x5   :  { %994 = vmatpush3.bf16.msra.mxu0 %v991_v3  ;;  %v1007_v15 = vpack.c.bf16 %v58_v14, %v57_v13  ;;  %v60_v17 = vld [vmem:[%s1629_s1 + $0x58] sm:$0xff]  ;;  %v61_v19 = vld [vmem:[%s1629_s1 + $0x60] sm:$0xff]  ;;  %v62_v20 = vld [vmem:[%s1629_s1 + $0x68] sm:$0xff] }
   0x6   :  { %996 = vmatprep.subr.bf16.mxu0 %v995_v5  ;;  %v1011_v18 = vpack.c.bf16 %v60_v17, %v59_v16  ;;  %v1015_v21 = vpack.c.bf16 %v62_v20, %v61_v19  ;;  %v63_v22 = vld [vmem:[%s1629_s1 + $0x70] sm:$0xff]  ;;  %v64_v23 = vld [vmem:[%s1629_s1 + $0x78] sm:$0xff]  ;;  %v18_v25 = vld [vmem:[%s1630_s0 + $0x8] sm:$0xff] }
   0x7   :  { %v1019_v24 = vpack.c.bf16 %v64_v23, %v63_v22  ;;  %v19_v26 = vld [vmem:[%s1630_s0 + $0x10] sm:$0xff]  ;;  %v20_v27 = vld [vmem:[%s1630_s0 + $0x18] sm:$0xff]  ;;  %v21_v28 = vld [vmem:[%s1630_s0 + $0x20] sm:$0xff] }
   0x8   :  { %v22_v29 = vld [vmem:[%s1630_s0 + $0x28] sm:$0xff]  ;;  %v23_v30 = vld [vmem:[%s1630_s0 + $0x30] sm:$0xff]  ;;  %v24_v31 = vld [vmem:[%s1630_s0 + $0x38] sm:$0xff] }
   0x9   :  { %998 = vmatpush3.bf16.msra.mxu0 %v995_v5  ;;  %v25_v32 = vld [vmem:[%s1630_s0 + $0x40] sm:$0xff]  ;;  %v26_v33 = vld [vmem:[%s1630_s0 + $0x48] sm:$0xff]  ;;  %v27_v34 = vld [vmem:[%s1630_s0 + $0x50] sm:$0xff] }
   0xa   :  { %1000 = vmatprep.subr.bf16.mxu0 %v999_v8  ;;  %v28_v35 = vld [vmem:[%s1630_s0 + $0x58] sm:$0xff]  ;;  %v29_v36 = vld [vmem:[%s1630_s0 + $0x60] sm:$0xff]  ;;  %v30_v37 = vld [vmem:[%s1630_s0 + $0x68] sm:$0xff] }
   0xb   :  { %v31_v38 = vld [vmem:[%s1630_s0 + $0x70] sm:$0xff]  ;;  %v32_v39 = vld [vmem:[%s1630_s0 + $0x78] sm:$0xff]  ;;  %v33_v40 = vld [vmem:[%s1630_s0 + $0x80] sm:$0xff] }
   0xc   :  { %v34_v41 = vld [vmem:[%s1630_s0 + $0x88] sm:$0xff]  ;;  %v35_v42 = vld [vmem:[%s1630_s0 + $0x90] sm:$0xff]  ;;  %v36_v43 = vld [vmem:[%s1630_s0 + $0x98] sm:$0xff] }
   0xd   :  { %1002 = vmatpush3.bf16.msra.mxu0 %v999_v8  ;;  %v37_v44 = vld [vmem:[%s1630_s0 + $0xa0] sm:$0xff]  ;;  %v38_v45 = vld [vmem:[%s1630_s0 + $0xa8] sm:$0xff]  ;;  %v39_v46 = vld [vmem:[%s1630_s0 + $0xb0] sm:$0xff] }
   0xe   :  { %1004 = vmatprep.subr.bf16.mxu0 %v1003_v12  ;;  %v40_v47 = vld [vmem:[%s1630_s0 + $0xb8] sm:$0xff]  ;;  %v41_v48 = vld [vmem:[%s1630_s0 + $0xc0] sm:$0xff]  ;;  %v42_v49 = vld [vmem:[%s1630_s0 + $0xc8] sm:$0xff] }
   0xf   :  { %v43_v50 = vld [vmem:[%s1630_s0 + $0xd0] sm:$0xff]  ;;  %v44_v51 = vld [vmem:[%s1630_s0 + $0xd8] sm:$0xff]  ;;  %v45_v52 = vld [vmem:[%s1630_s0 + $0xe0] sm:$0xff] }
  0x10   :  { %v46_v53 = vld [vmem:[%s1630_s0 + $0xe8] sm:$0xff]  ;;  %v47_v54 = vld [vmem:[%s1630_s0 + $0xf0] sm:$0xff]  ;;  %v48_v55 = vld [vmem:[%s1630_s0 + $0xf8] sm:$0xff] }
  0x11   :  { %1006 = vmatpush3.bf16.msra.mxu0 %v1003_v12  ;;  %v457_v56 = vld [vmem:[%s1631_s3] sm:$0xff]  ;;  %v458_v57 = vld [vmem:[%s1631_s3 + $0x8] sm:$0xff]  ;;  %v459_v58 = vld [vmem:[%s1631_s3 + $0x10] sm:$0xff] }
  0x12   :  { %1008 = vmatprep.subr.bf16.mxu0 %v1007_v15  ;;  %v1023_v59 = vpack.c.bf16 %v458_v57, %v457_v56  ;;  %v460_v60 = vld [vmem:[%s1631_s3 + $0x18] sm:$0xff]  ;;  %v461_v62 = vld [vmem:[%s1631_s3 + $0x20] sm:$0xff]  ;;  %v462_v63 = vld [vmem:[%s1631_s3 + $0x28] sm:$0xff] }
  0x13   :  { %v1027_v61 = vpack.c.bf16 %v460_v60, %v459_v58  ;;  %v1031_v0 = vpack.c.bf16 %v462_v63, %v461_v62  ;;  %v463_v1 = vld [vmem:[%s1631_s3 + $0x30] sm:$0xff]  ;;  %v464_v2 = vld [vmem:[%s1631_s3 + $0x38] sm:$0xff]  ;;  %v1315_v4 = vld [vmem:[%s1632_s2] ss:$0 sm:$0xff] }
  0x14   :  { %1024 = vmatprep.subr.bf16.mxu1 %v1023_v59  ;;  %v1035_v3 = vpack.c.bf16 %v464_v2, %v463_v1  ;;  %v471_v58 = vld [vmem:[%s1631_s3 + $0x70] sm:$0xff] }
  0x15   :  { %1010 = vmatpush3.bf16.msra.mxu0 %v1007_v15  ;;  %1026 = vmatpush3.bf16.msra.mxu1 %v1023_v59  ;;  %v472_v59 = vld [vmem:[%s1631_s3 + $0x78] sm:$0xff] }
  0x16   :  { %1012 = vmatprep.subr.bf16.mxu0 %v1011_v18  ;;  %1028 = vmatprep.subr.bf16.mxu1 %v1027_v61 }
  0x19   :  { %1014 = vmatpush3.bf16.msra.mxu0 %v1011_v18  ;;  %1030 = vmatpush3.bf16.msra.mxu1 %v1027_v61 }
  0x1a   :  { %1016 = vmatprep.subr.bf16.mxu0 %v1015_v21  ;;  %1032 = vmatprep.subr.bf16.mxu1 %v1031_v0 }
  0x1d   :  { %1018 = vmatpush3.bf16.msra.mxu0 %v1015_v21  ;;  %1034 = vmatpush3.bf16.msra.mxu1 %v1031_v0  ;;  %v1051_v0 = vpack.c.bf16 %v472_v59, %v471_v58 }
  0x1e   :  { %1020 = vmatprep.subr.bf16.mxu0 %v1019_v24  ;;  %1036 = vmatprep.subr.bf16.mxu1 %v1035_v3 }
  0x21   :  { %1022 = vmatpush3.bf16.msra.mxu0 %v1019_v24  ;;  %1038 = vmatpush3.bf16.msra.mxu1 %v1035_v3 }
  0x24   :  { %864 = vmatmul.mubr.f32.vlgmr.msra.gmra.mrb[0].mxu0 %v18_v25 }
  0x25   :  { %866 = vmatprep.mubr.f32.mxu0 %v19_v26 }
  0x28   :  { %867 = vmatmul.mubr.f32.gmra.mrb[2].mxu0 %v20_v27 }
  0x29   :  { %869 = vmatprep.mubr.f32.mxu0 %v21_v28 }
  0x2c   :  { %870 = vmatmul.mubr.f32.gmra.mrb[4].mxu0 %v22_v29 }
  0x2d   :  { %872 = vmatprep.mubr.f32.mxu0 %v23_v30 }
  0x30   :  { %873 = vmatmul.mubr.f32.gmra.mrb[6].mxu0 %v24_v31  ;;  %v465_v31 = vld [vmem:[%s1631_s3 + $0x40] sm:$0xff] }
  0x31   :  { %875 = vmatprep.mubr.f32.mxu0 %v25_v32  ;;  %v466_v32 = vld [vmem:[%s1631_s3 + $0x48] sm:$0xff] }
  0x34   :  { %876 = vmatmul.mubr.f32.gmra.mrb[8].mxu0 %v26_v33  ;;  %v1039_v33 = vpack.c.bf16 %v466_v32, %v465_v31 }
  0x35   :  { %878 = vmatprep.mubr.f32.mxu0 %v27_v34 }
  0x36   :  { %1040 = vmatprep.subr.bf16.mxu1 %v1039_v33 }
  0x37   :  { %1042 = vmatpush3.bf16.msra.mxu1 %v1039_v33 }
  0x38   :  { %879 = vmatmul.mubr.f32.gmra.mrb[10].mxu0 %v28_v35 }
  0x39   :  { %881 = vmatprep.mubr.f32.mxu0 %v29_v36 }
  0x3c   :  { %882 = vmatmul.mubr.f32.gmra.mrb[12].mxu0 %v30_v37 }
  0x3d   :  { %884 = vmatprep.mubr.f32.mxu0 %v31_v38 }
  0x40   :  { %885 = vmatmul.mubr.f32.gmra.mrb[14].mxu0 %v32_v39 }
  0x41   :  { %887 = vmatprep.mubr.f32.mxu0 %v33_v40  ;;  %v467_v40 = vld [vmem:[%s1631_s3 + $0x50] sm:$0xff] }
  0x44   :  { %888 = vmatmul.mubr.f32.gmra.mrb[16].mxu0 %v34_v41  ;;  %v468_v41 = vld [vmem:[%s1631_s3 + $0x58] sm:$0xff] }
  0x45   :  { %890 = vmatprep.mubr.f32.mxu0 %v35_v42 }
  0x48   :  { %891 = vmatmul.mubr.f32.gmra.mrb[18].mxu0 %v36_v43 }
  0x49   :  { %893 = vmatprep.mubr.f32.mxu0 %v37_v44 }
  0x4c   :  { %894 = vmatmul.mubr.f32.gmra.mrb[20].mxu0 %v38_v45 }
  0x4d   :  { %896 = vmatprep.mubr.f32.mxu0 %v39_v46  ;;  %v1043_v46 = vpack.c.bf16 %v468_v41, %v467_v40 }
  0x4f   :  { %1044 = vmatprep.subr.bf16.mxu1 %v1043_v46 }
  0x50   :  { %897 = vmatmul.mubr.f32.gmra.mrb[22].mxu0 %v40_v47  ;;  %1046 = vmatpush3.bf16.msra.mxu1 %v1043_v46 }
  0x51   :  { %899 = vmatprep.mubr.f32.mxu0 %v41_v48 }
  0x54   :  { %900 = vmatmul.mubr.f32.gmra.mrb[24].mxu0 %v42_v49  ;;  %v469_v49 = vld [vmem:[%s1631_s3 + $0x60] sm:$0xff] }
  0x55   :  { %902 = vmatprep.mubr.f32.mxu0 %v43_v50  ;;  %v470_v50 = vld [vmem:[%s1631_s3 + $0x68] sm:$0xff] }
  0x58   :  { %903 = vmatmul.mubr.f32.gmra.mrb[26].mxu0 %v44_v51 }
  0x59   :  { %905 = vmatprep.mubr.f32.mxu0 %v45_v52 }
  0x5c   :  { %906 = vmatmul.mubr.f32.gmra.mrb[28].mxu0 %v46_v53 }
  0x5d   :  { %908 = vmatprep.mubr.f32.mxu0 %v47_v54 }
  0x60   :  { %909 = vmatmul.mubr.f32.gmra.mrb[30].mxu0 %v48_v55  ;;  %v1047_v55 = vpack.c.bf16 %v470_v50, %v469_v49 }
  0x62   :  { %1048 = vmatprep.subr.bf16.mxu1 %v1047_v55 }
  0x63   :  { %1050 = vmatpush3.bf16.msra.mxu1 %v1047_v55 }
  0x64   :  { %1052 = vmatprep.subr.bf16.mxu1 %v1051_v0 }
  0x67   :  { %1054 = vmatpush3.bf16.msra.mxu1 %v1051_v0 }
  0xf7   :  { %v865_v5 = vpop.f32.mrb[0].mxu0 }
  0xf8   :  { %v138_v6 = vpop.f32.mrb[1].mxu0  ;;  %v1321_v8 = vadd.f32 %v865_v5, %v1315_v4 }
  0xf9   :  { %v1318_v7 = vadd.f32 %v1315_v4, %v138_v6 }
  0xfa   :  { %v298_v16 = vmul.f32 %v1321_v8, %v1321_v8 }
  0xfb   :  { %v868_v9 = vpop.f32.mrb[2].mxu0  ;;  %v297_v10 = vmul.f32 %v1318_v7, %v1318_v7 }
  0xfc   :  { %v148_v11 = vpop.f32.mrb[3].mxu0  ;;  %v1329_v13 = vadd.f32 %v868_v9, %v1315_v4 }
  0xfd   :  { %v1326_v12 = vadd.f32 %v1315_v4, %v148_v11  ;;  %329 = vadd.xlane.f32.xlu0 %v297_v10 }
  0xfe   :  { %v300_v21 = vmul.f32 %v1329_v13, %v1329_v13 }
  0xff   :  { %v871_v14 = vpop.f32.mrb[4].mxu0  ;;  %v299_v15 = vmul.f32 %v1326_v12, %v1326_v12 }
 0x100   :  { %v158_v17 = vpop.f32.mrb[5].mxu0  ;;  %v1339_v19 = vadd.f32 %v871_v14, %v1315_v4 }
 0x101   :  { %v1336_v18 = vadd.f32 %v1315_v4, %v158_v17  ;;  %333 = vadd.xlane.f32.xlu1 %v299_v15  ;;  %331 = vadd.xlane.f32.xlu0 %v298_v16 }
 0x102   :  { %v302_v27 = vmul.f32 %v1339_v19, %v1339_v19 }
 0x103   :  { %v874_v20 = vpop.f32.mrb[6].mxu0  ;;  %v301_v22 = vmul.f32 %v1336_v18, %v1336_v18 }
 0x104   :  { %v168_v23 = vpop.f32.mrb[7].mxu0  ;;  %v1349_v25 = vadd.f32 %v874_v20, %v1315_v4 }
 0x105   :  { %v1346_v24 = vadd.f32 %v1315_v4, %v168_v23  ;;  %335 = vadd.xlane.f32.xlu1 %v300_v21  ;;  %337 = vadd.xlane.f32.xlu0 %v301_v22 }
 0x106   :  { %v304_v36 = vmul.f32 %v1349_v25, %v1349_v25 }
 0x107   :  { %v877_v26 = vpop.f32.mrb[8].mxu0  ;;  %v303_v28 = vmul.f32 %v1346_v24, %v1346_v24 }
 0x108   :  { %v178_v29 = vpop.f32.mrb[9].mxu0  ;;  %v1365_v34 = vadd.f32 %v877_v26, %v1315_v4 }
 0x109   :  { %v1356_v30 = vadd.f32 %v1315_v4, %v178_v29  ;;  %339 = vadd.xlane.f32.xlu1 %v302_v27  ;;  %341 = vadd.xlane.f32.xlu0 %v303_v28 }
 0x10a   :  { %v306_v44 = vmul.f32 %v1365_v34, %v1365_v34 }
 0x10b   :  { %v880_v35 = vpop.f32.mrb[10].mxu0  ;;  %v305_v37 = vmul.f32 %v1356_v30, %v1356_v30 }
 0x10c   :  { %v188_v38 = vpop.f32.mrb[11].mxu0  ;;  %v1381_v42 = vadd.f32 %v880_v35, %v1315_v4 }
 0x10d   :  { %v1372_v39 = vadd.f32 %v1315_v4, %v188_v38  ;;  %343 = vadd.xlane.f32.xlu1 %v304_v36  ;;  %345 = vadd.xlane.f32.xlu0 %v305_v37 }
 0x10e   :  { %v308_v53 = vmul.f32 %v1381_v42, %v1381_v42 }
 0x10f   :  { %v883_v43 = vpop.f32.mrb[12].mxu0  ;;  %v307_v45 = vmul.f32 %v1372_v39, %v1372_v39 }
 0x110   :  { %v198_v47 = vpop.f32.mrb[13].mxu0  ;;  %v1397_v51 = vadd.f32 %v883_v43, %v1315_v4 }
 0x111   :  { %v1388_v48 = vadd.f32 %v1315_v4, %v198_v47  ;;  %347 = vadd.xlane.f32.xlu1 %v306_v44  ;;  %349 = vadd.xlane.f32.xlu0 %v307_v45 }
 0x112   :  { %v310_v62 = vmul.f32 %v1397_v51, %v1397_v51 }
 0x113   :  { %v886_v52 = vpop.f32.mrb[14].mxu0  ;;  %v309_v54 = vmul.f32 %v1388_v48, %v1388_v48 }
 0x114   :  { %v208_v56 = vpop.f32.mrb[15].mxu0  ;;  %v1413_v60 = vadd.f32 %v886_v52, %v1315_v4 }
 0x115   :  { %v1404_v57 = vadd.f32 %v1315_v4, %v208_v56  ;;  %351 = vadd.xlane.f32.xlu1 %v308_v53  ;;  %353 = vadd.xlane.f32.xlu0 %v309_v54 }
 0x116   :  { %v312_v6 = vmul.f32 %v1413_v60, %v1413_v60 }
 0x117   :  { %v889_v61 = vpop.f32.mrb[16].mxu0  ;;  %v311_v63 = vmul.f32 %v1404_v57, %v1404_v57 }
 0x118   :  { %v218_v1 = vpop.f32.mrb[17].mxu0  ;;  %v1423_v3 = vadd.f32 %v889_v61, %v1315_v4 }
 0x119   :  { %v1420_v2 = vadd.f32 %v1315_v4, %v218_v1  ;;  %355 = vadd.xlane.f32.xlu1 %v310_v62  ;;  %357 = vadd.xlane.f32.xlu0 %v311_v63 }
 0x11a   :  { %v314_v16 = vmul.f32 %v1423_v3, %v1423_v3 }
 0x11b   :  { %v892_v5 = vpop.f32.mrb[18].mxu0  ;;  %v313_v9 = vmul.f32 %v1420_v2, %v1420_v2 }
 0x11c   :  { %v228_v10 = vpop.f32.mrb[19].mxu0  ;;  %v1433_v14 = vadd.f32 %v892_v5, %v1315_v4 }
 0x11d   :  { %v1430_v11 = vadd.f32 %v1315_v4, %v228_v10  ;;  %359 = vadd.xlane.f32.xlu1 %v312_v6  ;;  %361 = vadd.xlane.f32.xlu0 %v313_v9 }
 0x11e   :  { %v316_v26 = vmul.f32 %v1433_v14, %v1433_v14 }
 0x11f   :  { %v895_v15 = vpop.f32.mrb[20].mxu0  ;;  %v315_v17 = vmul.f32 %v1430_v11, %v1430_v11 }
 0x120   :  { %v238_v20 = vpop.f32.mrb[21].mxu0  ;;  %v1443_v22 = vadd.f32 %v895_v15, %v1315_v4 }
 0x121   :  { %v1440_v21 = vadd.f32 %v1315_v4, %v238_v20  ;;  %363 = vadd.xlane.f32.xlu1 %v314_v16  ;;  %365 = vadd.xlane.f32.xlu0 %v315_v17 }
 0x122   :  { %v318_v33 = vmul.f32 %v1443_v22, %v1443_v22 }
 0x123   :  { %v898_v23 = vpop.f32.mrb[22].mxu0  ;;  %v317_v27 = vmul.f32 %v1440_v21, %v1440_v21 }
 0x124   :  { %v248_v28 = vpop.f32.mrb[23].mxu0  ;;  %v1453_v31 = vadd.f32 %v898_v23, %v1315_v4 }
 0x125   :  { %v1450_v29 = vadd.f32 %v1315_v4, %v248_v28  ;;  %367 = vadd.xlane.f32.xlu1 %v316_v26  ;;  %369 = vadd.xlane.f32.xlu0 %v317_v27 }
 0x126   :  { %v320_v41 = vmul.f32 %v1453_v31, %v1453_v31 }
 0x127   :  { %v901_v32 = vpop.f32.mrb[24].mxu0  ;;  %v319_v35 = vmul.f32 %v1450_v29, %v1450_v29 }
 0x128   :  { %v258_v36 = vpop.f32.mrb[25].mxu0  ;;  %v1463_v38 = vadd.f32 %v901_v32, %v1315_v4 }
 0x129   :  { %v1460_v37 = vadd.f32 %v1315_v4, %v258_v36  ;;  %371 = vadd.xlane.f32.xlu1 %v318_v33  ;;  %373 = vadd.xlane.f32.xlu0 %v319_v35 }
 0x12a   :  { %v322_v49 = vmul.f32 %v1463_v38, %v1463_v38 }
 0x12b   :  { %v904_v40 = vpop.f32.mrb[26].mxu0  ;;  %v321_v43 = vmul.f32 %v1460_v37, %v1460_v37 }
 0x12c   :  { %v268_v44 = vpop.f32.mrb[27].mxu0  ;;  %v1473_v46 = vadd.f32 %v904_v40, %v1315_v4 }
 0x12d   :  { %v1470_v45 = vadd.f32 %v1315_v4, %v268_v44  ;;  %375 = vadd.xlane.f32.xlu1 %v320_v41  ;;  %377 = vadd.xlane.f32.xlu0 %v321_v43 }
 0x12e   :  { %v324_v56 = vmul.f32 %v1473_v46, %v1473_v46 }
 0x12f   :  { %v907_v47 = vpop.f32.mrb[28].mxu0  ;;  %v323_v50 = vmul.f32 %v1470_v45, %v1470_v45 }
 0x130   :  { %v278_v52 = vpop.f32.mrb[29].mxu0  ;;  %v1483_v54 = vadd.f32 %v907_v47, %v1315_v4 }
 0x131   :  { %v1480_v53 = vadd.f32 %v1315_v4, %v278_v52  ;;  %379 = vadd.xlane.f32.xlu1 %v322_v49  ;;  %381 = vadd.xlane.f32.xlu0 %v323_v50 }
 0x132   :  { %v326_v63 = vmul.f32 %v1483_v54, %v1483_v54 }
 0x133   :  { %v910_v55 = vpop.f32.mrb[30].mxu0  ;;  %v325_v58 = vmul.f32 %v1480_v53, %v1480_v53 }
 0x134   :  { %v1490_v59 = vadd.f32 %v910_v55, %v1315_v4  ;;  %v288_v61 = vpop.f32.mrb[31].mxu0 }
 0x135   :  { %v1493_v62 = vadd.f32 %v1315_v4, %v288_v61  ;;  %383 = vadd.xlane.f32.xlu1 %v324_v56  ;;  %385 = vadd.xlane.f32.xlu0 %v325_v58 }
 0x136   :  { %v328_v1 = vmul.f32 %v1490_v59, %v1490_v59 }
 0x137   :  { %v327_v0 = vmul.f32 %v1493_v62, %v1493_v62 }
 0x139   :  { %387 = vadd.xlane.f32.xlu1 %v326_v63  ;;  %389 = vadd.xlane.f32.xlu0 %v327_v0 }
 0x13d   :  { %391 = vadd.xlane.f32.xlu1 %v328_v1 }
 0x18a   :  { %v330_v5 = vpop.xlane.xlu0 %329 }
 0x18b   :  { %1055 = vrsqrt.f32 %v330_v5 }
 0x18e   :  { %v334_v6 = vpop.xlane.xlu1 %333  ;;  %v332_v9 = vpop.xlane.xlu0 %331 }
 0x18f   :  { %1057 = vrsqrt.f32 %v334_v6 }
 0x190   :  { %1059 = vrsqrt.f32 %v332_v9 }
 0x192   :  { %v336_v4 = vpop.xlane.xlu1 %335  ;;  %v338_v10 = vpop.xlane.xlu0 %337 }
 0x193   :  { %1061 = vrsqrt.f32 %v336_v4 }
 0x194   :  { %1063 = vrsqrt.f32 %v338_v10 }
 0x195   :  { %v1056_v15 = vpop.eup %1055 }
 0x196   :  { %v340_v16 = vpop.xlane.xlu1 %339  ;;  %v342_v17 = vpop.xlane.xlu0 %341  ;;  %v425_v20 = vmul.f32 %v1056_v15, %v1318_v7 }
 0x197   :  { %1065 = vrsqrt.f32 %v340_v16 }
 0x198   :  { %1067 = vrsqrt.f32 %v342_v17  ;;  %943 = vmatprep.mubr.f32.mxu1 %v425_v20 }
 0x199   :  { %v1058_v23 = vpop.eup %1057 }
 0x19a   :  { %v1060_v26 = vpop.eup %1059  ;;  %v344_v27 = vpop.xlane.xlu1 %343  ;;  %v427_v32 = vmul.f32 %v1058_v23, %v1326_v12 }
 0x19b   :  { %v346_v28 = vpop.xlane.xlu0 %345  ;;  %1069 = vrsqrt.f32 %v344_v27  ;;  %v426_v33 = vmul.f32 %v1060_v26, %v1321_v8 }
 0x19c   :  { %1071 = vrsqrt.f32 %v346_v28 }
 0x19d   :  { %v1062_v35 = vpop.eup %1061  ;;  %944 = vmatmul.mubr.f32.vlgmr.msra.gmra.mrb[0].mxu1 %v426_v33 }
 0x19e   :  { %v1064_v36 = vpop.eup %1063  ;;  %946 = vmatprep.mubr.f32.mxu1 %v427_v32  ;;  %v348_v40 = vpop.xlane.xlu1 %347  ;;  %v428_v7 = vmul.f32 %v1062_v35, %v1329_v13 }
 0x19f   :  { %v350_v41 = vpop.xlane.xlu0 %349  ;;  %1073 = vrsqrt.f32 %v348_v40  ;;  %v429_v43 = vmul.f32 %v1064_v36, %v1336_v18 }
 0x1a0   :  { %1075 = vrsqrt.f32 %v350_v41 }
 0x1a1   :  { %v1066_v44 = vpop.eup %1065  ;;  %947 = vmatmul.mubr.f32.gmra.mrb[2].mxu1 %v428_v7 }
 0x1a2   :  { %v1068_v47 = vpop.eup %1067  ;;  %949 = vmatprep.mubr.f32.mxu1 %v429_v43  ;;  %v352_v12 = vpop.xlane.xlu1 %351  ;;  %v430_v8 = vmul.f32 %v1066_v44, %v1339_v19 }
 0x1a3   :  { %v354_v49 = vpop.xlane.xlu0 %353  ;;  %1077 = vrsqrt.f32 %v352_v12  ;;  %v431_v50 = vmul.f32 %v1068_v47, %v1346_v24 }
 0x1a4   :  { %1079 = vrsqrt.f32 %v354_v49 }
 0x1a5   :  { %v1070_v52 = vpop.eup %1069  ;;  %950 = vmatmul.mubr.f32.gmra.mrb[4].mxu1 %v430_v8 }
 0x1a6   :  { %v1072_v55 = vpop.eup %1071  ;;  %952 = vmatprep.mubr.f32.mxu1 %v431_v50  ;;  %v356_v13 = vpop.xlane.xlu1 %355  ;;  %v432_v18 = vmul.f32 %v1070_v52, %v1349_v25 }
 0x1a7   :  { %v358_v56 = vpop.xlane.xlu0 %357  ;;  %1081 = vrsqrt.f32 %v356_v13  ;;  %v433_v58 = vmul.f32 %v1072_v55, %v1356_v30 }
 0x1a8   :  { %1083 = vrsqrt.f32 %v358_v56 }
 0x1a9   :  { %v1074_v61 = vpop.eup %1073  ;;  %953 = vmatmul.mubr.f32.gmra.mrb[6].mxu1 %v432_v18 }
 0x1aa   :  { %v1076_v63 = vpop.eup %1075  ;;  %955 = vmatprep.mubr.f32.mxu1 %v433_v58  ;;  %v360_v19 = vpop.xlane.xlu1 %359  ;;  %v434_v24 = vmul.f32 %v1074_v61, %v1365_v34 }
 0x1ab   :  { %v362_v0 = vpop.xlane.xlu0 %361  ;;  %1085 = vrsqrt.f32 %v360_v19  ;;  %v435_v1 = vmul.f32 %v1076_v63, %v1372_v39 }
 0x1ac   :  { %1087 = vrsqrt.f32 %v362_v0 }
 0x1ad   :  { %v1078_v5 = vpop.eup %1077  ;;  %956 = vmatmul.mubr.f32.gmra.mrb[8].mxu1 %v434_v24 }
 0x1ae   :  { %v1080_v6 = vpop.eup %1079  ;;  %958 = vmatprep.mubr.f32.mxu1 %v435_v1  ;;  %v364_v25 = vpop.xlane.xlu1 %363  ;;  %v436_v30 = vmul.f32 %v1078_v5, %v1381_v42 }
 0x1af   :  { %v366_v9 = vpop.xlane.xlu0 %365  ;;  %1089 = vrsqrt.f32 %v364_v25  ;;  %v437_v4 = vmul.f32 %v1080_v6, %v1388_v48 }
 0x1b0   :  { %1091 = vrsqrt.f32 %v366_v9 }
 0x1b1   :  { %v1082_v10 = vpop.eup %1081  ;;  %959 = vmatmul.mubr.f32.gmra.mrb[10].mxu1 %v436_v30 }
 0x1b2   :  { %v1084_v15 = vpop.eup %1083  ;;  %961 = vmatprep.mubr.f32.mxu1 %v437_v4  ;;  %v368_v34 = vpop.xlane.xlu1 %367  ;;  %v438_v39 = vmul.f32 %v1082_v10, %v1397_v51 }
 0x1b3   :  { %v370_v16 = vpop.xlane.xlu0 %369  ;;  %1093 = vrsqrt.f32 %v368_v34  ;;  %v439_v17 = vmul.f32 %v1084_v15, %v1404_v57 }
 0x1b4   :  { %1095 = vrsqrt.f32 %v370_v16 }
 0x1b5   :  { %v1086_v20 = vpop.eup %1085  ;;  %962 = vmatmul.mubr.f32.gmra.mrb[12].mxu1 %v438_v39 }
 0x1b6   :  { %v1088_v23 = vpop.eup %1087  ;;  %964 = vmatprep.mubr.f32.mxu1 %v439_v17  ;;  %v372_v42 = vpop.xlane.xlu1 %371  ;;  %v440_v48 = vmul.f32 %v1086_v20, %v1413_v60 }
 0x1b7   :  { %v374_v26 = vpop.xlane.xlu0 %373  ;;  %1097 = vrsqrt.f32 %v372_v42  ;;  %v441_v27 = vmul.f32 %v1088_v23, %v1420_v2 }
 0x1b8   :  { %1099 = vrsqrt.f32 %v374_v26 }
 0x1b9   :  { %v1090_v28 = vpop.eup %1089  ;;  %965 = vmatmul.mubr.f32.gmra.mrb[14].mxu1 %v440_v48 }
 0x1ba   :  { %v1092_v32 = vpop.eup %1091  ;;  %967 = vmatprep.mubr.f32.mxu1 %v441_v27  ;;  %v376_v51 = vpop.xlane.xlu1 %375  ;;  %v442_v57 = vmul.f32 %v1090_v28, %v1423_v3 }
 0x1bb   :  { %v378_v33 = vpop.xlane.xlu0 %377  ;;  %1101 = vrsqrt.f32 %v376_v51  ;;  %v443_v35 = vmul.f32 %v1092_v32, %v1430_v11 }
 0x1bc   :  { %1103 = vrsqrt.f32 %v378_v33 }
 0x1bd   :  { %v1094_v36 = vpop.eup %1093  ;;  %968 = vmatmul.mubr.f32.gmra.mrb[16].mxu1 %v442_v57 }
 0x1be   :  { %v1096_v40 = vpop.eup %1095  ;;  %970 = vmatprep.mubr.f32.mxu1 %v443_v35  ;;  %v380_v60 = vpop.xlane.xlu1 %379  ;;  %v444_v2 = vmul.f32 %v1094_v36, %v1433_v14 }
 0x1bf   :  { %v382_v41 = vpop.xlane.xlu0 %381  ;;  %1105 = vrsqrt.f32 %v380_v60  ;;  %v445_v7 = vmul.f32 %v1096_v40, %v1440_v21 }
 0x1c0   :  { %1107 = vrsqrt.f32 %v382_v41 }
 0x1c1   :  { %v1098_v43 = vpop.eup %1097  ;;  %971 = vmatmul.mubr.f32.gmra.mrb[18].mxu1 %v444_v2 }
 0x1c2   :  { %v1100_v44 = vpop.eup %1099  ;;  %973 = vmatprep.mubr.f32.mxu1 %v445_v7  ;;  %v384_v3 = vpop.xlane.xlu1 %383  ;;  %v446_v11 = vmul.f32 %v1098_v43, %v1443_v22 }
 0x1c3   :  { %v386_v47 = vpop.xlane.xlu0 %385  ;;  %1109 = vrsqrt.f32 %v384_v3  ;;  %v447_v12 = vmul.f32 %v1100_v44, %v1450_v29 }
 0x1c4   :  { %1111 = vrsqrt.f32 %v386_v47 }
 0x1c5   :  { %v1102_v49 = vpop.eup %1101  ;;  %974 = vmatmul.mubr.f32.gmra.mrb[20].mxu1 %v446_v11 }
 0x1c6   :  { %v1104_v8 = vpop.eup %1103  ;;  %976 = vmatprep.mubr.f32.mxu1 %v447_v12  ;;  %v388_v14 = vpop.xlane.xlu1 %387  ;;  %v448_v21 = vmul.f32 %v1102_v49, %v1453_v31 }
 0x1c7   :  { %v390_v50 = vpop.xlane.xlu0 %389  ;;  %1113 = vrsqrt.f32 %v388_v14  ;;  %v449_v52 = vmul.f32 %v1104_v8, %v1460_v37 }
 0x1c8   :  { %1115 = vrsqrt.f32 %v390_v50 }
 0x1c9   :  { %v1106_v55 = vpop.eup %1105  ;;  %977 = vmatmul.mubr.f32.gmra.mrb[22].mxu1 %v448_v21 }
 0x1ca   :  { %v1108_v13 = vpop.eup %1107  ;;  %979 = vmatprep.mubr.f32.mxu1 %v449_v52  ;;  %v392_v22 = vpop.xlane.xlu1 %391  ;;  %v450_v29 = vmul.f32 %v1106_v55, %v1463_v38 }
 0x1cb   :  { %1117 = vrsqrt.f32 %v392_v22  ;;  %v451_v56 = vmul.f32 %v1108_v13, %v1470_v45 }
 0x1cd   :  { %v1110_v18 = vpop.eup %1109  ;;  %980 = vmatmul.mubr.f32.gmra.mrb[24].mxu1 %v450_v29 }
 0x1ce   :  { %v1112_v58 = vpop.eup %1111  ;;  %982 = vmatprep.mubr.f32.mxu1 %v451_v56  ;;  %v452_v31 = vmul.f32 %v1110_v18, %v1473_v46 }
 0x1cf   :  { %v453_v61 = vmul.f32 %v1112_v58, %v1480_v53 }
 0x1d1   :  { %v1114_v37 = vpop.eup %1113  ;;  %983 = vmatmul.mubr.f32.gmra.mrb[26].mxu1 %v452_v31 }
 0x1d2   :  { %v1116_v63 = vpop.eup %1115  ;;  %985 = vmatprep.mubr.f32.mxu1 %v453_v61  ;;  %v454_v19 = vmul.f32 %v1114_v37, %v1483_v54 }
 0x1d3   :  { %v455_v0 = vmul.f32 %v1116_v63, %v1493_v62 }
 0x1d5   :  { %v1118_v38 = vpop.eup %1117  ;;  %986 = vmatmul.mubr.f32.gmra.mrb[28].mxu1 %v454_v19 }
 0x1d6   :  { %988 = vmatprep.mubr.f32.mxu1 %v455_v0  ;;  %v456_v45 = vmul.f32 %v1118_v38, %v1490_v59 }
 0x1d9   :  { %989 = vmatmul.mubr.f32.gmra.mrb[30].mxu1 %v456_v45 }
 0x270   :  { %v945_v24 = vpop.f32.mrb[0].mxu1 }
 0x271   :  { %699 = vst [vmem:[%s1633_s4 + $0x8] sm:$0xff] %v945_v24  ;;  %v539_v46 = vpop.f32.mrb[1].mxu1 }
 0x272   :  { %698 = vst [vmem:[%s1633_s4] sm:$0xff] %v539_v46 }
 0x274   :  { %v948_v53 = vpop.f32.mrb[2].mxu1 }
 0x275   :  { %701 = vst [vmem:[%s1633_s4 + $0x18] sm:$0xff] %v948_v53  ;;  %v549_v54 = vpop.f32.mrb[3].mxu1 }
 0x276   :  { %700 = vst [vmem:[%s1633_s4 + $0x10] sm:$0xff] %v549_v54 }
 0x278   :  { %v951_v59 = vpop.f32.mrb[4].mxu1 }
 0x279   :  { %703 = vst [vmem:[%s1633_s4 + $0x28] sm:$0xff] %v951_v59  ;;  %v559_v62 = vpop.f32.mrb[5].mxu1 }
 0x27a   :  { %702 = vst [vmem:[%s1633_s4 + $0x20] sm:$0xff] %v559_v62 }
 0x27c   :  { %v954_v1 = vpop.f32.mrb[6].mxu1 }
 0x27d   :  { %705 = vst [vmem:[%s1633_s4 + $0x38] sm:$0xff] %v954_v1  ;;  %v569_v5 = vpop.f32.mrb[7].mxu1 }
 0x27e   :  { %704 = vst [vmem:[%s1633_s4 + $0x30] sm:$0xff] %v569_v5 }
 0x280   :  { %v957_v6 = vpop.f32.mrb[8].mxu1 }
 0x281   :  { %707 = vst [vmem:[%s1633_s4 + $0x48] sm:$0xff] %v957_v6  ;;  %v579_v25 = vpop.f32.mrb[9].mxu1 }
 0x282   :  { %706 = vst [vmem:[%s1633_s4 + $0x40] sm:$0xff] %v579_v25 }
 0x284   :  { %v960_v9 = vpop.f32.mrb[10].mxu1 }
 0x285   :  { %709 = vst [vmem:[%s1633_s4 + $0x58] sm:$0xff] %v960_v9  ;;  %v589_v30 = vpop.f32.mrb[11].mxu1 }
 0x286   :  { %708 = vst [vmem:[%s1633_s4 + $0x50] sm:$0xff] %v589_v30 }
 0x288   :  { %v963_v4 = vpop.f32.mrb[12].mxu1 }
 0x289   :  { %711 = vst [vmem:[%s1633_s4 + $0x68] sm:$0xff] %v963_v4  ;;  %v599_v10 = vpop.f32.mrb[13].mxu1 }
 0x28a   :  { %710 = vst [vmem:[%s1633_s4 + $0x60] sm:$0xff] %v599_v10 }
 0x28c   :  { %v966_v15 = vpop.f32.mrb[14].mxu1 }
 0x28d   :  { %713 = vst [vmem:[%s1633_s4 + $0x78] sm:$0xff] %v966_v15  ;;  %v609_v34 = vpop.f32.mrb[15].mxu1 }
 0x28e   :  { %712 = vst [vmem:[%s1633_s4 + $0x70] sm:$0xff] %v609_v34 }
 0x290   :  { %v969_v16 = vpop.f32.mrb[16].mxu1 }
 0x291   :  { %715 = vst [vmem:[%s1633_s4 + $0x88] sm:$0xff] %v969_v16  ;;  %v619_v39 = vpop.f32.mrb[17].mxu1 }
 0x292   :  { %714 = vst [vmem:[%s1633_s4 + $0x80] sm:$0xff] %v619_v39 }
 0x294   :  { %v972_v17 = vpop.f32.mrb[18].mxu1 }
 0x295   :  { %717 = vst [vmem:[%s1633_s4 + $0x98] sm:$0xff] %v972_v17  ;;  %v629_v20 = vpop.f32.mrb[19].mxu1 }
 0x296   :  { %716 = vst [vmem:[%s1633_s4 + $0x90] sm:$0xff] %v629_v20 }
 0x298   :  { %v975_v23 = vpop.f32.mrb[20].mxu1 }
 0x299   :  { %719 = vst [vmem:[%s1633_s4 + $0xa8] sm:$0xff] %v975_v23  ;;  %v639_v42 = vpop.f32.mrb[21].mxu1 }
 0x29a   :  { %718 = vst [vmem:[%s1633_s4 + $0xa0] sm:$0xff] %v639_v42 }
 0x29c   :  { %v978_v26 = vpop.f32.mrb[22].mxu1 }
 0x29d   :  { %721 = vst [vmem:[%s1633_s4 + $0xb8] sm:$0xff] %v978_v26  ;;  %v649_v48 = vpop.f32.mrb[23].mxu1 }
 0x29e   :  { %720 = vst [vmem:[%s1633_s4 + $0xb0] sm:$0xff] %v649_v48 }
 0x2a0   :  { %v981_v27 = vpop.f32.mrb[24].mxu1 }
 0x2a1   :  { %723 = vst [vmem:[%s1633_s4 + $0xc8] sm:$0xff] %v981_v27  ;;  %v659_v28 = vpop.f32.mrb[25].mxu1 }
 0x2a2   :  { %722 = vst [vmem:[%s1633_s4 + $0xc0] sm:$0xff] %v659_v28 }
 0x2a4   :  { %v984_v32 = vpop.f32.mrb[26].mxu1 }
 0x2a5   :  { %725 = vst [vmem:[%s1633_s4 + $0xd8] sm:$0xff] %v984_v32  ;;  %v669_v51 = vpop.f32.mrb[27].mxu1 }
 0x2a6   :  { %724 = vst [vmem:[%s1633_s4 + $0xd0] sm:$0xff] %v669_v51 }
 0x2a8   :  { %v987_v33 = vpop.f32.mrb[28].mxu1 }
 0x2a9   :  { %727 = vst [vmem:[%s1633_s4 + $0xe8] sm:$0xff] %v987_v33  ;;  %v679_v57 = vpop.f32.mrb[29].mxu1 }
 0x2aa   :  { %726 = vst [vmem:[%s1633_s4 + $0xe0] sm:$0xff] %v679_v57 }
 0x2ac   :  { %v990_v35 = vpop.f32.mrb[30].mxu1 }
 0x2ad   :  { %729 = vst [vmem:[%s1633_s4 + $0xf8] sm:$0xff] %v990_v35  ;;  %v689_v36 = vpop.f32.mrb[31].mxu1 }
 0x2ae   :  { %728 = vst [vmem:[%s1633_s4 + $0xf0] sm:$0xff] %v689_v36 }

// kernel: recon_kernels.4
= control target key start
LH: loop header
LB: loop body
LE: loop exit
PB: predicated region body
PF: predicated region fallthrough
CT: control target
= control target key end

     0   :  { %s1727_s1 = inlined_call_operand.vmem [shape: f32[256,128], index: 1, kind: input, shape index: {}]   ;;  %s1728_s0 = inlined_call_operand.vmem [shape: bf16[256,256], index: 0, kind: input, shape index: {}]   ;;  %s1729_s3 = inlined_call_operand.vmem [shape: f32[128,128], index: 3, kind: input, shape index: {}]   ;;  %s1730_s2 = inlined_call_operand.vmem [shape: f32[1,128], index: 2, kind: input, shape index: {}]   ;;  %s1731_s4 = inlined_call_operand.vmem [shape: f32[256,128], index: 4, kind: output, shape index: {}]  }
   0x1   :  { %v72_v0 = vld [vmem:[%s1727_s1 + $0x80] sm:$0xff]  ;;  %v73_v1 = vld [vmem:[%s1727_s1 + $0x88] sm:$0xff]  ;;  %v74_v5 = vld [vmem:[%s1727_s1 + $0x90] sm:$0xff] }
   0x2   :  { %v56_v2 = vld [vmem:[%s1727_s1] sm:$0xff]  ;;  %v96_v3 = vpack.c.bf16 %v73_v1, %v72_v0  ;;  %v57_v4 = vld [vmem:[%s1727_s1 + $0x8] sm:$0xff]  ;;  %v75_v6 = vld [vmem:[%s1727_s1 + $0x98] sm:$0xff] }
   0x3   :  { %v88_v7 = vpack.c.bf16 %v57_v4, %v56_v2  ;;  %v97_v8 = vpack.c.bf16 %v75_v6, %v74_v5  ;;  %v58_v9 = vld [vmem:[%s1727_s1 + $0x10] sm:$0xff]  ;;  %v59_v10 = vld [vmem:[%s1727_s1 + $0x18] sm:$0xff]  ;;  %v76_v11 = vld [vmem:[%s1727_s1 + $0xa0] sm:$0xff] }
   0x4   :  { %969 = vmatprep.subr.bf16.mxu0 %v96_v3  ;;  %v77_v12 = vld [vmem:[%s1727_s1 + $0xa8] sm:$0xff]  ;;  %1241 = vmatprep.subr.bf16.mxu1 %v96_v3  ;;  %v89_v13 = vpack.c.bf16 %v59_v10, %v58_v9  ;;  %v60_v15 = vld [vmem:[%s1727_s1 + $0x20] sm:$0xff]  ;;  %v78_v17 = vld [vmem:[%s1727_s1 + $0xb0] sm:$0xff] }
   0x5   :  { %970 = vmatpush3.bf16.msra.mxu0 %v88_v7  ;;  %1249 = vmatpush3.bf16.msra.mxu1 %v88_v7  ;;  %v98_v14 = vpack.c.bf16 %v77_v12, %v76_v11  ;;  %v61_v16 = vld [vmem:[%s1727_s1 + $0x28] sm:$0xff]  ;;  %v79_v18 = vld [vmem:[%s1727_s1 + $0xb8] sm:$0xff]  ;;  %v62_v21 = vld [vmem:[%s1727_s1 + $0x30] sm:$0xff] }
   0x6   :  { %971 = vmatprep.subr.bf16.mxu0 %v97_v8  ;;  %1242 = vmatprep.subr.bf16.mxu1 %v97_v8  ;;  %v90_v19 = vpack.c.bf16 %v61_v16, %v60_v15  ;;  %v99_v20 = vpack.c.bf16 %v79_v18, %v78_v17  ;;  %v63_v22 = vld [vmem:[%s1727_s1 + $0x38] sm:$0xff]  ;;  %v80_v23 = vld [vmem:[%s1727_s1 + $0xc0] sm:$0xff]  ;;  %v81_v24 = vld [vmem:[%s1727_s1 + $0xc8] sm:$0xff] }
   0x7   :  { %v1259_v25 = vld [vmem:[%s1728_s0 + $0x4] ss:$8 sps:$4 sm:$0xff]   ;;  %v91_v26 = vpack.c.bf16 %v63_v22, %v62_v21  ;;  %v100_v28 = vpack.c.bf16 %v81_v24, %v80_v23  ;;  %v82_v30 = vld [vmem:[%s1727_s1 + $0xd0] sm:$0xff]  ;;  %v83_v31 = vld [vmem:[%s1727_s1 + $0xd8] sm:$0xff] }
   0x8   :  { %v64_v27 = vld [vmem:[%s1727_s1 + $0x40] sm:$0xff]  ;;  %v65_v29 = vld [vmem:[%s1727_s1 + $0x48] sm:$0xff]  ;;  %360 = vmatprep.mubr.bf16.mxu0 %v1259_v25  ;;  %v66_v33 = vld [vmem:[%s1727_s1 + $0x50] sm:$0xff]  ;;  %v101_v34 = vpack.c.bf16 %v83_v31, %v82_v30 }
   0x9   :  { %972 = vmatpush3.bf16.msra.mxu0 %v89_v13  ;;  %1250 = vmatpush3.bf16.msra.mxu1 %v89_v13  ;;  %v92_v32 = vpack.c.bf16 %v65_v29, %v64_v27  ;;  %v67_v35 = vld [vmem:[%s1727_s1 + $0x58] sm:$0xff]  ;;  %v84_v36 = vld [vmem:[%s1727_s1 + $0xe0] sm:$0xff]  ;;  %v85_v37 = vld [vmem:[%s1727_s1 + $0xe8] sm:$0xff] }
   0xa   :  { %973 = vmatprep.subr.bf16.mxu0 %v98_v14  ;;  %1243 = vmatprep.subr.bf16.mxu1 %v98_v14  ;;  %v93_v38 = vpack.c.bf16 %v67_v35, %v66_v33  ;;  %v68_v39 = vld [vmem:[%s1727_s1 + $0x60] sm:$0xff]  ;;  %v102_v40 = vpack.c.bf16 %v85_v37, %v84_v36  ;;  %v69_v41 = vld [vmem:[%s1727_s1 + $0x68] sm:$0xff]  ;;  %v86_v42 = vld [vmem:[%s1727_s1 + $0xf0] sm:$0xff] }
   0xb   :  { %v87_v43 = vld [vmem:[%s1727_s1 + $0xf8] sm:$0xff]  ;;  %v70_v44 = vld [vmem:[%s1727_s1 + $0x70] sm:$0xff]  ;;  %v94_v45 = vpack.c.bf16 %v69_v41, %v68_v39  ;;  %v1289_v48 = vld [vmem:[%s1728_s0 + $0xc4] ss:$8 sps:$4 sm:$0xff]  }
   0xc   :  { %v71_v46 = vld [vmem:[%s1727_s1 + $0x78] sm:$0xff]  ;;  %v103_v47 = vpack.c.bf16 %v87_v43, %v86_v42  ;;  %456 = vmatprep.mubr.bf16.mxu1 %v1289_v48  ;;  %v1257_v50 = vld [vmem:[%s1728_s0] ss:$8 sps:$4 sm:$0xff]   ;;  %v661_v56 = vld [vmem:[%s1729_s3 + $0x10] sm:$0xff] }
   0xd   :  { %974 = vmatpush3.bf16.msra.mxu0 %v90_v19  ;;  %1251 = vmatpush3.bf16.msra.mxu1 %v90_v19  ;;  %v95_v49 = vpack.c.bf16 %v71_v46, %v70_v44  ;;  %v1260_v51 = vld [vmem:[%s1728_s0 + $0x14] ss:$8 sps:$4 sm:$0xff]   ;;  %v1287_v52 = vld [vmem:[%s1728_s0 + $0xc0] ss:$8 sps:$4 sm:$0xff]   ;;  %v1262_v62 = vld [vmem:[%s1728_s0 + $0x10] ss:$8 sps:$4 sm:$0xff]  }
   0xe   :  { %975 = vmatprep.subr.bf16.mxu0 %v99_v20  ;;  %1244 = vmatprep.subr.bf16.mxu1 %v99_v20  ;;  %v1293_v53 = vld [vmem:[%s1728_s0 + $0xd4] ss:$8 sps:$4 sm:$0xff]   ;;  %v659_v54 = vld [vmem:[%s1729_s3] sm:$0xff]  ;;  %v660_v55 = vld [vmem:[%s1729_s3 + $0x8] sm:$0xff] }
   0xf   :  { %v1209_v57 = vpack.c.bf16 %v660_v55, %v659_v54  ;;  %v662_v58 = vld [vmem:[%s1729_s3 + $0x18] sm:$0xff]  ;;  %v663_v60 = vld [vmem:[%s1729_s3 + $0x20] sm:$0xff]  ;;  %v664_v61 = vld [vmem:[%s1729_s3 + $0x28] sm:$0xff] }
  0x10   :  { %v1213_v59 = vpack.c.bf16 %v662_v58, %v661_v56  ;;  %v1263_v63 = vld [vmem:[%s1728_s0 + $0x24] ss:$8 sps:$4 sm:$0xff]   ;;  %v1295_v0 = vld [vmem:[%s1728_s0 + $0xd0] ss:$8 sps:$4 sm:$0xff]   ;;  %v1217_v4 = vpack.c.bf16 %v664_v61, %v663_v60  ;;  %v1265_v8 = vld [vmem:[%s1728_s0 + $0x20] ss:$8 sps:$4 sm:$0xff]  }
  0x11   :  { %976 = vmatpush3.bf16.msra.mxu0 %v91_v26  ;;  %1252 = vmatpush3.bf16.msra.mxu1 %v91_v26  ;;  %v1299_v1 = vld [vmem:[%s1728_s0 + $0xe4] ss:$8 sps:$4 sm:$0xff]   ;;  %v665_v2 = vld [vmem:[%s1729_s3 + $0x30] sm:$0xff]  ;;  %v666_v3 = vld [vmem:[%s1729_s3 + $0x38] sm:$0xff] }
  0x12   :  { %977 = vmatprep.subr.bf16.mxu0 %v100_v28  ;;  %1245 = vmatprep.subr.bf16.mxu1 %v100_v28  ;;  %v1221_v5 = vpack.c.bf16 %v666_v3, %v665_v2  ;;  %v667_v6 = vld [vmem:[%s1729_s3 + $0x40] sm:$0xff]  ;;  %v668_v7 = vld [vmem:[%s1729_s3 + $0x48] sm:$0xff]  ;;  %v1266_v9 = vld [vmem:[%s1728_s0 + $0x34] ss:$8 sps:$4 sm:$0xff]  }
  0x13   :  { %v1301_v10 = vld [vmem:[%s1728_s0 + $0xe0] ss:$8 sps:$4 sm:$0xff]   ;;  %v1302_v11 = vld [vmem:[%s1728_s0 + $0xf4] ss:$8 sps:$4 sm:$0xff]   ;;  %v1225_v14 = vpack.c.bf16 %v668_v7, %v667_v6  ;;  %v1268_v16 = vld [vmem:[%s1728_s0 + $0x30] ss:$8 sps:$4 sm:$0xff]  }
  0x14   :  { %v669_v12 = vld [vmem:[%s1729_s3 + $0x50] sm:$0xff]  ;;  %v670_v13 = vld [vmem:[%s1729_s3 + $0x58] sm:$0xff]  ;;  %v1269_v18 = vld [vmem:[%s1728_s0 + $0x44] ss:$8 sps:$4 sm:$0xff]  }
  0x15   :  { %978 = vmatpush3.bf16.msra.mxu0 %v92_v32  ;;  %1253 = vmatpush3.bf16.msra.mxu1 %v92_v32  ;;  %v1229_v15 = vpack.c.bf16 %v670_v13, %v669_v12  ;;  %v1304_v17 = vld [vmem:[%s1728_s0 + $0xf0] ss:$8 sps:$4 sm:$0xff]   ;;  %v1271_v19 = vld [vmem:[%s1728_s0 + $0x40] ss:$8 sps:$4 sm:$0xff]   ;;  %v1272_v20 = vld [vmem:[%s1728_s0 + $0x54] ss:$8 sps:$4 sm:$0xff]  }
  0x16   :  { %979 = vmatprep.subr.bf16.mxu0 %v101_v34  ;;  %1246 = vmatprep.subr.bf16.mxu1 %v101_v34  ;;  %v1274_v21 = vld [vmem:[%s1728_s0 + $0x50] ss:$8 sps:$4 sm:$0xff]   ;;  %v1275_v22 = vld [vmem:[%s1728_s0 + $0x64] ss:$8 sps:$4 sm:$0xff]   ;;  %v1277_v23 = vld [vmem:[%s1728_s0 + $0x60] ss:$8 sps:$4 sm:$0xff]  }
  0x17   :  { %v1278_v24 = vld [vmem:[%s1728_s0 + $0x74] ss:$8 sps:$4 sm:$0xff]   ;;  %v1280_v25 = vld [vmem:[%s1728_s0 + $0x70] ss:$8 sps:$4 sm:$0xff]   ;;  %v1281_v26 = vld [vmem:[%s1728_s0 + $0x84] ss:$8 sps:$4 sm:$0xff]  }
  0x18   :  { %v1283_v27 = vld [vmem:[%s1728_s0 + $0x80] ss:$8 sps:$4 sm:$0xff]   ;;  %v1284_v28 = vld [vmem:[%s1728_s0 + $0x94] ss:$8 sps:$4 sm:$0xff]   ;;  %v1286_v29 = vld [vmem:[%s1728_s0 + $0x90] ss:$8 sps:$4 sm:$0xff]  }
  0x19   :  { %980 = vmatpush3.bf16.msra.mxu0 %v93_v38  ;;  %1254 = vmatpush3.bf16.msra.mxu1 %v93_v38  ;;  %v1290_v30 = vld [vmem:[%s1728_s0 + $0xa4] ss:$8 sps:$4 sm:$0xff]   ;;  %v1292_v31 = vld [vmem:[%s1728_s0 + $0xa0] ss:$8 sps:$4 sm:$0xff]   ;;  %v1296_v32 = vld [vmem:[%s1728_s0 + $0xb4] ss:$8 sps:$4 sm:$0xff]  }
  0x1a   :  { %981 = vmatprep.subr.bf16.mxu0 %v102_v40  ;;  %1247 = vmatprep.subr.bf16.mxu1 %v102_v40  ;;  %v671_v33 = vld [vmem:[%s1729_s3 + $0x60] sm:$0xff]  ;;  %v672_v34 = vld [vmem:[%s1729_s3 + $0x68] sm:$0xff]  ;;  %v1298_v36 = vld [vmem:[%s1728_s0 + $0xb0] ss:$8 sps:$4 sm:$0xff]  }
  0x1b   :  { %v1233_v35 = vpack.c.bf16 %v672_v34, %v671_v33  ;;  %v673_v37 = vld [vmem:[%s1729_s3 + $0x70] sm:$0xff]  ;;  %v674_v38 = vld [vmem:[%s1729_s3 + $0x78] sm:$0xff]  ;;  %v1573_v43 = vld [vmem:[%s1730_s2] ss:$0 sm:$0xff] }
  0x1c   :  { %v1237_v39 = vpack.c.bf16 %v674_v38, %v673_v37 }
  0x1d   :  { %982 = vmatpush3.bf16.msra.mxu0 %v94_v45  ;;  %1255 = vmatpush3.bf16.msra.mxu1 %v94_v45 }
  0x1e   :  { %983 = vmatprep.subr.bf16.mxu0 %v103_v47  ;;  %1248 = vmatprep.subr.bf16.mxu1 %v103_v47 }
  0x21   :  { %984 = vmatpush3.bf16.msra.mxu0 %v95_v49  ;;  %1256 = vmatpush3.bf16.msra.mxu1 %v95_v49 }
  0x22   :  { %1210 = vmatprep.subr.bf16.mxu1 %v1209_v57 }
  0x24   :  { %361 = vmatmul.mubr.bf16.vlgmr.msra.gmra.mrb[0].mxu0 %v1257_v50  ;;  %457 = vmatmul.mubr.bf16.vlgmr.msra.gmra.mrb[0].mxu1 %v1287_v52 }
  0x25   :  { %368 = vmatprep.mubr.bf16.mxu0 %v1260_v51  ;;  %464 = vmatprep.mubr.bf16.mxu1 %v1293_v53 }
  0x26   :  { %1212 = vmatpush3.bf16.msra.mxu1 %v1209_v57 }
  0x27   :  { %1214 = vmatprep.subr.bf16.mxu1 %v1213_v59 }
  0x2a   :  { %1216 = vmatpush3.bf16.msra.mxu1 %v1213_v59 }
  0x2b   :  { %1218 = vmatprep.subr.bf16.mxu1 %v1217_v4 }
  0x2c   :  { %369 = vmatmul.mubr.bf16.gmra.mrb[4].mxu0 %v1262_v62  ;;  %465 = vmatmul.mubr.bf16.gmra.mrb[4].mxu1 %v1295_v0 }
  0x2d   :  { %376 = vmatprep.mubr.bf16.mxu0 %v1263_v63  ;;  %472 = vmatprep.mubr.bf16.mxu1 %v1299_v1 }
  0x2e   :  { %1220 = vmatpush3.bf16.msra.mxu1 %v1217_v4 }
  0x2f   :  { %1222 = vmatprep.subr.bf16.mxu1 %v1221_v5 }
  0x32   :  { %1224 = vmatpush3.bf16.msra.mxu1 %v1221_v5 }
  0x33   :  { %1226 = vmatprep.subr.bf16.mxu1 %v1225_v14 }
  0x34   :  { %377 = vmatmul.mubr.bf16.gmra.mrb[8].mxu0 %v1265_v8  ;;  %473 = vmatmul.mubr.bf16.gmra.mrb[8].mxu1 %v1301_v10 }
  0x35   :  { %384 = vmatprep.mubr.bf16.mxu0 %v1266_v9  ;;  %480 = vmatprep.mubr.bf16.mxu1 %v1302_v11 }
  0x36   :  { %1228 = vmatpush3.bf16.msra.mxu1 %v1225_v14 }
  0x37   :  { %1230 = vmatprep.subr.bf16.mxu1 %v1229_v15 }
  0x3a   :  { %1232 = vmatpush3.bf16.msra.mxu1 %v1229_v15 }
  0x3b   :  { %1234 = vmatprep.subr.bf16.mxu1 %v1233_v35 }
  0x3c   :  { %385 = vmatmul.mubr.bf16.gmra.mrb[12].mxu0 %v1268_v16  ;;  %481 = vmatmul.mubr.bf16.gmra.mrb[12].mxu1 %v1304_v17 }
  0x3d   :  { %392 = vmatprep.mubr.bf16.mxu0 %v1269_v18 }
  0x3e   :  { %1236 = vmatpush3.bf16.msra.mxu1 %v1233_v35 }
  0x3f   :  { %1238 = vmatprep.subr.bf16.mxu1 %v1237_v39 }
  0x42   :  { %1240 = vmatpush3.bf16.msra.mxu1 %v1237_v39 }
  0x44   :  { %393 = vmatmul.mubr.bf16.gmra.mrb[16].mxu0 %v1271_v19 }
  0x45   :  { %400 = vmatprep.mubr.bf16.mxu0 %v1272_v20 }
  0x4c   :  { %401 = vmatmul.mubr.bf16.gmra.mrb[20].mxu0 %v1274_v21 }
  0x4d   :  { %408 = vmatprep.mubr.bf16.mxu0 %v1275_v22 }
  0x54   :  { %409 = vmatmul.mubr.bf16.gmra.mrb[24].mxu0 %v1277_v23 }
  0x55   :  { %416 = vmatprep.mubr.bf16.mxu0 %v1278_v24 }
  0x5c   :  { %417 = vmatmul.mubr.bf16.gmra.mrb[28].mxu0 %v1280_v25 }
  0x5d   :  { %424 = vmatprep.mubr.bf16.mxu0 %v1281_v26 }
  0x64   :  { %425 = vmatmul.mubr.bf16.gmra.mrb[32].mxu0 %v1283_v27 }
  0x65   :  { %432 = vmatprep.mubr.bf16.mxu0 %v1284_v28 }
  0x6c   :  { %433 = vmatmul.mubr.bf16.gmra.mrb[36].mxu0 %v1286_v29 }
  0x6d   :  { %440 = vmatprep.mubr.bf16.mxu0 %v1290_v30 }
  0x74   :  { %441 = vmatmul.mubr.bf16.gmra.mrb[40].mxu0 %v1292_v31 }
  0x75   :  { %448 = vmatprep.mubr.bf16.mxu0 %v1296_v32 }
  0x7c   :  { %449 = vmatmul.mubr.bf16.gmra.mrb[44].mxu0 %v1298_v36 }
  0xf7   :  { %v985_v40 = vpop.f32.mrb[0].mxu0  ;;  %v1057_v41 = vpop.f32.mrb[0].mxu1 }
  0xf8   :  { %v986_v42 = vpop.f32.mrb[1].mxu0  ;;  %v1058_v44 = vpop.f32.mrb[1].mxu1 }
  0xf9   :  { %v987_v45 = vadd.f32 %v986_v42, %v985_v40  ;;  %v988_v46 = vpop.f32.mrb[2].mxu0  ;;  %v1575_v47 = vadd.f32 %v1058_v44, %v1057_v41  ;;  %v1060_v48 = vpop.f32.mrb[2].mxu1 }
  0xfa   :  { %v989_v49 = vpop.f32.mrb[3].mxu0  ;;  %v1061_v50 = vpop.f32.mrb[3].mxu1 }
  0xfb   :  { %v595_v51 = vadd.f32 %v987_v45, %v1573_v43  ;;  %v990_v52 = vadd.f32 %v989_v49, %v988_v46  ;;  %v1578_v53 = vadd.f32 %v1061_v50, %v1060_v48 }
  0xfd   :  { %v627_v54 = vmax.f32 %v595_v51, 0.0  ;;  %v596_v55 = vadd.f32 %v990_v52, %v1573_v43 }
  0xff   :  { %v628_v56 = vmax.f32 %v596_v55, 0.0  ;;  %v991_v57 = vpop.f32.mrb[4].mxu0  ;;  %1161 = vmatprep.mubr.f32.mxu1 %v627_v54  ;;  %v1063_v58 = vpop.f32.mrb[4].mxu1 }
 0x100   :  { %v992_v59 = vpop.f32.mrb[5].mxu0  ;;  %v1064_v60 = vpop.f32.mrb[5].mxu1 }
 0x101   :  { %v993_v61 = vadd.f32 %v992_v59, %v991_v57  ;;  %v994_v62 = vpop.f32.mrb[6].mxu0  ;;  %1162 = vmatmul.mubr.f32.vlgmr.msra.gmra.mrb[16].mxu1 %v628_v56  ;;  %v1581_v63 = vadd.f32 %v1064_v60, %v1063_v58  ;;  %v1066_v0 = vpop.f32.mrb[6].mxu1 }
 0x102   :  { %v995_v1 = vpop.f32.mrb[7].mxu0  ;;  %v1067_v2 = vpop.f32.mrb[7].mxu1 }
 0x103   :  { %v597_v3 = vadd.f32 %v993_v61, %v1573_v43  ;;  %v996_v4 = vadd.f32 %v995_v1, %v994_v62  ;;  %v1584_v5 = vadd.f32 %v1067_v2, %v1066_v0 }
 0x105   :  { %v629_v6 = vmax.f32 %v597_v3, 0.0  ;;  %v598_v7 = vadd.f32 %v996_v4, %v1573_v43 }
 0x107   :  { %v630_v8 = vmax.f32 %v598_v7, 0.0  ;;  %v997_v9 = vpop.f32.mrb[8].mxu0  ;;  %1164 = vmatprep.mubr.f32.mxu1 %v629_v6  ;;  %v1069_v10 = vpop.f32.mrb[8].mxu1 }
 0x108   :  { %v998_v11 = vpop.f32.mrb[9].mxu0  ;;  %v1070_v12 = vpop.f32.mrb[9].mxu1 }
 0x109   :  { %v999_v13 = vadd.f32 %v998_v11, %v997_v9  ;;  %v1000_v14 = vpop.f32.mrb[10].mxu0  ;;  %1165 = vmatmul.mubr.f32.gmra.mrb[18].mxu1 %v630_v8  ;;  %v1587_v15 = vadd.f32 %v1070_v12, %v1069_v10  ;;  %v1072_v16 = vpop.f32.mrb[10].mxu1 }
 0x10a   :  { %v1001_v17 = vpop.f32.mrb[11].mxu0  ;;  %v1073_v18 = vpop.f32.mrb[11].mxu1 }
 0x10b   :  { %v599_v19 = vadd.f32 %v999_v13, %v1573_v43  ;;  %v1002_v20 = vadd.f32 %v1001_v17, %v1000_v14  ;;  %v1590_v21 = vadd.f32 %v1073_v18, %v1072_v16 }
 0x10d   :  { %v631_v22 = vmax.f32 %v599_v19, 0.0  ;;  %v600_v23 = vadd.f32 %v1002_v20, %v1573_v43 }
 0x10f   :  { %v632_v24 = vmax.f32 %v600_v23, 0.0  ;;  %v1003_v25 = vpop.f32.mrb[12].mxu0  ;;  %1167 = vmatprep.mubr.f32.mxu1 %v631_v22  ;;  %v1075_v26 = vpop.f32.mrb[12].mxu1 }
 0x110   :  { %v1004_v27 = vpop.f32.mrb[13].mxu0  ;;  %v1076_v28 = vpop.f32.mrb[13].mxu1 }
 0x111   :  { %v1005_v29 = vadd.f32 %v1004_v27, %v1003_v25  ;;  %v1006_v30 = vpop.f32.mrb[14].mxu0  ;;  %1168 = vmatmul.mubr.f32.gmra.mrb[20].mxu1 %v632_v24  ;;  %v1593_v31 = vadd.f32 %v1076_v28, %v1075_v26  ;;  %v1078_v32 = vpop.f32.mrb[14].mxu1 }
 0x112   :  { %v1007_v33 = vpop.f32.mrb[15].mxu0  ;;  %v1079_v34 = vpop.f32.mrb[15].mxu1 }
 0x113   :  { %v601_v35 = vadd.f32 %v1005_v29, %v1573_v43  ;;  %v1008_v36 = vadd.f32 %v1007_v33, %v1006_v30  ;;  %v1596_v37 = vadd.f32 %v1079_v34, %v1078_v32 }
 0x115   :  { %v633_v38 = vmax.f32 %v601_v35, 0.0  ;;  %v602_v39 = vadd.f32 %v1008_v36, %v1573_v43 }
 0x117   :  { %v634_v40 = vmax.f32 %v602_v39, 0.0  ;;  %v1009_v41 = vpop.f32.mrb[16].mxu0  ;;  %1170 = vmatprep.mubr.f32.mxu1 %v633_v38 }
 0x118   :  { %v1010_v42 = vpop.f32.mrb[17].mxu0 }
 0x119   :  { %v1011_v44 = vadd.f32 %v1010_v42, %v1009_v41  ;;  %v1012_v45 = vpop.f32.mrb[18].mxu0  ;;  %1171 = vmatmul.mubr.f32.gmra.mrb[22].mxu1 %v634_v40 }
 0x11a   :  { %v1013_v46 = vpop.f32.mrb[19].mxu0 }
 0x11b   :  { %v603_v48 = vadd.f32 %v1011_v44, %v1573_v43  ;;  %v1014_v49 = vadd.f32 %v1013_v46, %v1012_v45 }
 0x11d   :  { %v635_v50 = vmax.f32 %v603_v48, 0.0  ;;  %v604_v51 = vadd.f32 %v1014_v49, %v1573_v43 }
 0x11f   :  { %v636_v52 = vmax.f32 %v604_v51, 0.0  ;;  %v1015_v54 = vpop.f32.mrb[20].mxu0  ;;  %1173 = vmatprep.mubr.f32.mxu1 %v635_v50 }
 0x120   :  { %v1016_v55 = vpop.f32.mrb[21].mxu0 }
 0x121   :  { %v1017_v56 = vadd.f32 %v1016_v55, %v1015_v54  ;;  %v1018_v57 = vpop.f32.mrb[22].mxu0  ;;  %1174 = vmatmul.mubr.f32.gmra.mrb[24].mxu1 %v636_v52 }
 0x122   :  { %v1019_v58 = vpop.f32.mrb[23].mxu0 }
 0x123   :  { %v605_v59 = vadd.f32 %v1017_v56, %v1573_v43  ;;  %v1020_v60 = vadd.f32 %v1019_v58, %v1018_v57 }
 0x125   :  { %v637_v61 = vmax.f32 %v605_v59, 0.0  ;;  %v606_v62 = vadd.f32 %v1020_v60, %v1573_v43 }
 0x127   :  { %v638_v0 = vmax.f32 %v606_v62, 0.0  ;;  %v1021_v1 = vpop.f32.mrb[24].mxu0  ;;  %1176 = vmatprep.mubr.f32.mxu1 %v637_v61 }
 0x128   :  { %v1022_v2 = vpop.f32.mrb[25].mxu0 }
 0x129   :  { %v1023_v3 = vadd.f32 %v1022_v2, %v1021_v1  ;;  %v1024_v4 = vpop.f32.mrb[26].mxu0  ;;  %1177 = vmatmul.mubr.f32.gmra.mrb[26].mxu1 %v638_v0 }
 0x12a   :  { %v1025_v6 = vpop.f32.mrb[27].mxu0 }
 0x12b   :  { %v607_v7 = vadd.f32 %v1023_v3, %v1573_v43  ;;  %v1026_v8 = vadd.f32 %v1025_v6, %v1024_v4  ;;  %v619_v3 = vadd.f32 %v1575_v47, %v1573_v43  ;;  %v623_v47 = vadd.f32 %v1587_v15, %v1573_v43 }
 0x12d   :  { %v639_v9 = vmax.f32 %v607_v7, 0.0  ;;  %v608_v10 = vadd.f32 %v1026_v8, %v1573_v43  ;;  %v620_v7 = vadd.f32 %v1578_v53, %v1573_v43  ;;  %v625_v53 = vadd.f32 %v1593_v31, %v1573_v43 }
 0x12f   :  { %v640_v11 = vmax.f32 %v608_v10, 0.0  ;;  %v1027_v12 = vpop.f32.mrb[28].mxu0  ;;  %1179 = vmatprep.mubr.f32.mxu1 %v639_v9  ;;  %v651_v9 = vmax.f32 %v619_v3, 0.0  ;;  %v621_v10 = vadd.f32 %v1581_v63, %v1573_v43  ;;  %v655_v63 = vmax.f32 %v623_v47, 0.0 }
 0x130   :  { %v1028_v13 = vpop.f32.mrb[29].mxu0 }
 0x131   :  { %v1029_v14 = vadd.f32 %v1028_v13, %v1027_v12  ;;  %v1030_v16 = vpop.f32.mrb[30].mxu0  ;;  %1180 = vmatmul.mubr.f32.gmra.mrb[28].mxu1 %v640_v11  ;;  %v652_v11 = vmax.f32 %v620_v7, 0.0  ;;  %v622_v12 = vadd.f32 %v1584_v5, %v1573_v43  ;;  %v653_v13 = vmax.f32 %v621_v10, 0.0 }
 0x132   :  { %v1031_v17 = vpop.f32.mrb[31].mxu0  ;;  %v626_v5 = vadd.f32 %v1596_v37, %v1573_v43 }
 0x133   :  { %v609_v18 = vadd.f32 %v1029_v14, %v1573_v43  ;;  %v1032_v19 = vadd.f32 %v1031_v17, %v1030_v16  ;;  %v654_v14 = vmax.f32 %v622_v12, 0.0  ;;  %v624_v16 = vadd.f32 %v1590_v21, %v1573_v43 }
 0x134   :  { %v657_v17 = vmax.f32 %v625_v53, 0.0  ;;  %v658_v15 = vmax.f32 %v626_v5, 0.0 }
 0x135   :  { %v641_v20 = vmax.f32 %v609_v18, 0.0  ;;  %v610_v22 = vadd.f32 %v1032_v19, %v1573_v43  ;;  %v656_v18 = vmax.f32 %v624_v16, 0.0 }
 0x137   :  { %v642_v23 = vmax.f32 %v610_v22, 0.0  ;;  %v1033_v24 = vpop.f32.mrb[32].mxu0  ;;  %1182 = vmatprep.mubr.f32.mxu1 %v641_v20 }
 0x138   :  { %v1034_v25 = vpop.f32.mrb[33].mxu0 }
 0x139   :  { %v1035_v26 = vadd.f32 %v1034_v25, %v1033_v24  ;;  %v1036_v27 = vpop.f32.mrb[34].mxu0  ;;  %1183 = vmatmul.mubr.f32.gmra.mrb[30].mxu1 %v642_v23 }
 0x13a   :  { %v1037_v28 = vpop.f32.mrb[35].mxu0 }
 0x13b   :  { %v611_v29 = vadd.f32 %v1035_v26, %v1573_v43  ;;  %v1038_v30 = vadd.f32 %v1037_v28, %v1036_v27 }
 0x13d   :  { %v643_v32 = vmax.f32 %v611_v29, 0.0  ;;  %v612_v33 = vadd.f32 %v1038_v30, %v1573_v43 }
 0x13f   :  { %v644_v34 = vmax.f32 %v612_v33, 0.0  ;;  %v1039_v35 = vpop.f32.mrb[36].mxu0  ;;  %1185 = vmatprep.mubr.f32.mxu1 %v643_v32 }
 0x140   :  { %v1040_v36 = vpop.f32.mrb[37].mxu0 }
 0x141   :  { %v1041_v38 = vadd.f32 %v1040_v36, %v1039_v35  ;;  %v1042_v39 = vpop.f32.mrb[38].mxu0  ;;  %1186 = vmatmul.mubr.f32.gmra.mrb[32].mxu1 %v644_v34 }
 0x142   :  { %v1043_v40 = vpop.f32.mrb[39].mxu0 }
 0x143   :  { %v613_v41 = vadd.f32 %v1041_v38, %v1573_v43  ;;  %v1044_v42 = vadd.f32 %v1043_v40, %v1042_v39 }
 0x145   :  { %v645_v44 = vmax.f32 %v613_v41, 0.0  ;;  %v614_v45 = vadd.f32 %v1044_v42, %v1573_v43 }
 0x147   :  { %v646_v46 = vmax.f32 %v614_v45, 0.0  ;;  %v1045_v48 = vpop.f32.mrb[40].mxu0  ;;  %1188 = vmatprep.mubr.f32.mxu1 %v645_v44 }
 0x148   :  { %v1046_v49 = vpop.f32.mrb[41].mxu0 }
 0x149   :  { %v1047_v50 = vadd.f32 %v1046_v49, %v1045_v48  ;;  %v1048_v51 = vpop.f32.mrb[42].mxu0  ;;  %1189 = vmatmul.mubr.f32.gmra.mrb[34].mxu1 %v646_v46 }
 0x14a   :  { %v1049_v52 = vpop.f32.mrb[43].mxu0 }
 0x14b   :  { %v615_v54 = vadd.f32 %v1047_v50, %v1573_v43  ;;  %v1050_v55 = vadd.f32 %v1049_v52, %v1048_v51 }
 0x14d   :  { %v647_v56 = vmax.f32 %v615_v54, 0.0  ;;  %v616_v57 = vadd.f32 %v1050_v55, %v1573_v43 }
 0x14f   :  { %v648_v58 = vmax.f32 %v616_v57, 0.0  ;;  %v1051_v59 = vpop.f32.mrb[44].mxu0  ;;  %1191 = vmatprep.mubr.f32.mxu1 %v647_v56 }
 0x150   :  { %v1052_v60 = vpop.f32.mrb[45].mxu0 }
 0x151   :  { %v1053_v61 = vadd.f32 %v1052_v60, %v1051_v59  ;;  %v1054_v62 = vpop.f32.mrb[46].mxu0  ;;  %1192 = vmatmul.mubr.f32.gmra.mrb[36].mxu1 %v648_v58 }
 0x152   :  { %v1055_v0 = vpop.f32.mrb[47].mxu0 }
 0x153   :  { %v617_v1 = vadd.f32 %v1053_v61, %v1573_v43  ;;  %v1056_v2 = vadd.f32 %v1055_v0, %v1054_v62 }
 0x155   :  { %v649_v4 = vmax.f32 %v617_v1, 0.0  ;;  %v618_v6 = vadd.f32 %v1056_v2, %v1573_v43 }
 0x157   :  { %v650_v8 = vmax.f32 %v618_v6, 0.0  ;;  %1194 = vmatprep.mubr.f32.mxu1 %v649_v4 }
 0x159   :  { %1195 = vmatmul.mubr.f32.gmra.mrb[38].mxu1 %v650_v8 }
 0x15a   :  { %1197 = vmatprep.mubr.f32.mxu1 %v651_v9 }
 0x15d   :  { %1198 = vmatmul.mubr.f32.gmra.mrb[40].mxu1 %v652_v11 }
 0x15e   :  { %1200 = vmatprep.mubr.f32.mxu1 %v653_v13 }
 0x161   :  { %1201 = vmatmul.mubr.f32.gmra.mrb[42].mxu1 %v654_v14 }
 0x162   :  { %1203 = vmatprep.mubr.f32.mxu1 %v655_v63 }
 0x165   :  { %1204 = vmatmul.mubr.f32.gmra.mrb[44].mxu1 %v656_v18 }
 0x166   :  { %1206 = vmatprep.mubr.f32.mxu1 %v657_v17 }
 0x169   :  { %1207 = vmatmul.mubr.f32.gmra.mrb[46].mxu1 %v658_v15 }
 0x1d4   :  { %v1163_v19 = vpop.f32.mrb[16].mxu1 }
 0x1d5   :  { %901 = vst [vmem:[%s1731_s4 + $0x8] sm:$0xff] %v1163_v19  ;;  %v741_v31 = vpop.f32.mrb[17].mxu1 }
 0x1d6   :  { %900 = vst [vmem:[%s1731_s4] sm:$0xff] %v741_v31 }
 0x1dc   :  { %v1166_v21 = vpop.f32.mrb[18].mxu1 }
 0x1dd   :  { %903 = vst [vmem:[%s1731_s4 + $0x18] sm:$0xff] %v1166_v21  ;;  %v751_v43 = vpop.f32.mrb[19].mxu1 }
 0x1de   :  { %902 = vst [vmem:[%s1731_s4 + $0x10] sm:$0xff] %v751_v43 }
 0x1e4   :  { %v1169_v37 = vpop.f32.mrb[20].mxu1 }
 0x1e5   :  { %905 = vst [vmem:[%s1731_s4 + $0x28] sm:$0xff] %v1169_v37  ;;  %v761_v20 = vpop.f32.mrb[21].mxu1 }
 0x1e6   :  { %904 = vst [vmem:[%s1731_s4 + $0x20] sm:$0xff] %v761_v20 }
 0x1ec   :  { %v1172_v22 = vpop.f32.mrb[22].mxu1 }
 0x1ed   :  { %907 = vst [vmem:[%s1731_s4 + $0x38] sm:$0xff] %v1172_v22  ;;  %v771_v23 = vpop.f32.mrb[23].mxu1 }
 0x1ee   :  { %906 = vst [vmem:[%s1731_s4 + $0x30] sm:$0xff] %v771_v23 }
 0x1f4   :  { %v1175_v24 = vpop.f32.mrb[24].mxu1 }
 0x1f5   :  { %909 = vst [vmem:[%s1731_s4 + $0x48] sm:$0xff] %v1175_v24  ;;  %v781_v25 = vpop.f32.mrb[25].mxu1 }
 0x1f6   :  { %908 = vst [vmem:[%s1731_s4 + $0x40] sm:$0xff] %v781_v25 }
 0x1fc   :  { %v1178_v26 = vpop.f32.mrb[26].mxu1 }
 0x1fd   :  { %911 = vst [vmem:[%s1731_s4 + $0x58] sm:$0xff] %v1178_v26  ;;  %v791_v27 = vpop.f32.mrb[27].mxu1 }
 0x1fe   :  { %910 = vst [vmem:[%s1731_s4 + $0x50] sm:$0xff] %v791_v27 }
 0x204   :  { %v1181_v28 = vpop.f32.mrb[28].mxu1 }
 0x205   :  { %913 = vst [vmem:[%s1731_s4 + $0x68] sm:$0xff] %v1181_v28  ;;  %v801_v29 = vpop.f32.mrb[29].mxu1 }
 0x206   :  { %912 = vst [vmem:[%s1731_s4 + $0x60] sm:$0xff] %v801_v29 }
 0x20c   :  { %v1184_v30 = vpop.f32.mrb[30].mxu1 }
 0x20d   :  { %915 = vst [vmem:[%s1731_s4 + $0x78] sm:$0xff] %v1184_v30  ;;  %v811_v32 = vpop.f32.mrb[31].mxu1 }
 0x20e   :  { %914 = vst [vmem:[%s1731_s4 + $0x70] sm:$0xff] %v811_v32 }
 0x214   :  { %v1187_v33 = vpop.f32.mrb[32].mxu1 }
 0x215   :  { %917 = vst [vmem:[%s1731_s4 + $0x88] sm:$0xff] %v1187_v33  ;;  %v821_v34 = vpop.f32.mrb[33].mxu1 }
 0x216   :  { %916 = vst [vmem:[%s1731_s4 + $0x80] sm:$0xff] %v821_v34 }
 0x21c   :  { %v1190_v35 = vpop.f32.mrb[34].mxu1 }
 0x21d   :  { %919 = vst [vmem:[%s1731_s4 + $0x98] sm:$0xff] %v1190_v35  ;;  %v831_v36 = vpop.f32.mrb[35].mxu1 }
 0x21e   :  { %918 = vst [vmem:[%s1731_s4 + $0x90] sm:$0xff] %v831_v36 }
 0x224   :  { %v1193_v38 = vpop.f32.mrb[36].mxu1 }
 0x225   :  { %921 = vst [vmem:[%s1731_s4 + $0xa8] sm:$0xff] %v1193_v38  ;;  %v841_v39 = vpop.f32.mrb[37].mxu1 }
 0x226   :  { %920 = vst [vmem:[%s1731_s4 + $0xa0] sm:$0xff] %v841_v39 }
 0x22c   :  { %v1196_v40 = vpop.f32.mrb[38].mxu1 }
 0x22d   :  { %923 = vst [vmem:[%s1731_s4 + $0xb8] sm:$0xff] %v1196_v40  ;;  %v851_v41 = vpop.f32.mrb[39].mxu1 }
 0x22e   :  { %922 = vst [vmem:[%s1731_s4 + $0xb0] sm:$0xff] %v851_v41 }
 0x230   :  { %v1199_v42 = vpop.f32.mrb[40].mxu1 }
 0x231   :  { %925 = vst [vmem:[%s1731_s4 + $0xc8] sm:$0xff] %v1199_v42  ;;  %v861_v44 = vpop.f32.mrb[41].mxu1 }
 0x232   :  { %924 = vst [vmem:[%s1731_s4 + $0xc0] sm:$0xff] %v861_v44 }
 0x234   :  { %v1202_v45 = vpop.f32.mrb[42].mxu1 }
 0x235   :  { %927 = vst [vmem:[%s1731_s4 + $0xd8] sm:$0xff] %v1202_v45  ;;  %v871_v46 = vpop.f32.mrb[43].mxu1 }
 0x236   :  { %926 = vst [vmem:[%s1731_s4 + $0xd0] sm:$0xff] %v871_v46 }
 0x238   :  { %v1205_v48 = vpop.f32.mrb[44].mxu1 }
 0x239   :  { %929 = vst [vmem:[%s1731_s4 + $0xe8] sm:$0xff] %v1205_v48  ;;  %v881_v49 = vpop.f32.mrb[45].mxu1 }
 0x23a   :  { %928 = vst [vmem:[%s1731_s4 + $0xe0] sm:$0xff] %v881_v49 }
 0x23c   :  { %v1208_v50 = vpop.f32.mrb[46].mxu1 }
 0x23d   :  { %931 = vst [vmem:[%s1731_s4 + $0xf8] sm:$0xff] %v1208_v50  ;;  %v891_v51 = vpop.f32.mrb[47].mxu1 }
 0x23e   :  { %930 = vst [vmem:[%s1731_s4 + $0xf0] sm:$0xff] %v891_v51 }

// kernel: recon_kernels.5
= control target key start
LH: loop header
LB: loop body
LE: loop exit
PB: predicated region body
PF: predicated region fallthrough
CT: control target
= control target key end

     0   :  { %s2067_s0 = inlined_call_operand.vmem [shape: bf16[256,256], index: 0, kind: input, shape index: {}]   ;;  %s2068_s1 = inlined_call_operand.vmem [shape: f32[256,128], index: 1, kind: input, shape index: {}]   ;;  %s2069_s2 = inlined_call_operand.vmem [shape: f32[1,128], index: 2, kind: input, shape index: {}]   ;;  %s2070_s3 = inlined_call_operand.vmem [shape: f32[128,128], index: 3, kind: input, shape index: {}]   ;;  %s2071_s4 = inlined_call_operand.vmem [shape: f32[1,128], index: 4, kind: input, shape index: {}]   ;;  %s2072_s5 = inlined_call_operand.vmem [shape: f32[256,128], index: 5, kind: input, shape index: {}]   ;;  %s2073_s6 = inlined_call_operand.hbm [shape: f32[1,256], index: 6, kind: output, shape index: {}]  }
   0x1   :  { %v79_v0 = vld [vmem:[%s2068_s1 + $0x80] sm:$0xff]  ;;  %v80_v1 = vld [vmem:[%s2068_s1 + $0x88] sm:$0xff]  ;;  %v81_v5 = vld [vmem:[%s2068_s1 + $0x90] sm:$0xff] }
   0x2   :  { %v63_v2 = vld [vmem:[%s2068_s1] sm:$0xff]  ;;  %v103_v3 = vpack.c.bf16 %v80_v1, %v79_v0  ;;  %v64_v4 = vld [vmem:[%s2068_s1 + $0x8] sm:$0xff]  ;;  %v82_v6 = vld [vmem:[%s2068_s1 + $0x98] sm:$0xff] }
   0x3   :  { %v95_v7 = vpack.c.bf16 %v64_v4, %v63_v2  ;;  %v104_v8 = vpack.c.bf16 %v82_v6, %v81_v5  ;;  %v65_v9 = vld [vmem:[%s2068_s1 + $0x10] sm:$0xff]  ;;  %v66_v10 = vld [vmem:[%s2068_s1 + $0x18] sm:$0xff]  ;;  %v83_v11 = vld [vmem:[%s2068_s1 + $0xa0] sm:$0xff] }
   0x4   :  { %1120 = vmatprep.subr.bf16.mxu0 %v103_v3  ;;  %v84_v12 = vld [vmem:[%s2068_s1 + $0xa8] sm:$0xff]  ;;  %v96_v13 = vpack.c.bf16 %v66_v10, %v65_v9  ;;  %v67_v15 = vld [vmem:[%s2068_s1 + $0x20] sm:$0xff]  ;;  %v85_v17 = vld [vmem:[%s2068_s1 + $0xb0] sm:$0xff] }
   0x5   :  { %1121 = vmatpush3.bf16.msra.mxu0 %v95_v7  ;;  %v105_v14 = vpack.c.bf16 %v84_v12, %v83_v11  ;;  %v68_v16 = vld [vmem:[%s2068_s1 + $0x28] sm:$0xff]  ;;  %v86_v18 = vld [vmem:[%s2068_s1 + $0xb8] sm:$0xff]  ;;  %v69_v21 = vld [vmem:[%s2068_s1 + $0x30] sm:$0xff] }
   0x6   :  { %1122 = vmatprep.subr.bf16.mxu0 %v104_v8  ;;  %v97_v19 = vpack.c.bf16 %v68_v16, %v67_v15  ;;  %v106_v20 = vpack.c.bf16 %v86_v18, %v85_v17  ;;  %v70_v22 = vld [vmem:[%s2068_s1 + $0x38] sm:$0xff]  ;;  %v87_v23 = vld [vmem:[%s2068_s1 + $0xc0] sm:$0xff]  ;;  %v88_v24 = vld [vmem:[%s2068_s1 + $0xc8] sm:$0xff] }
   0x7   :  { %v1463_v25 = vld [vmem:[%s2067_s0 + $0x4] ss:$8 sps:$4 sm:$0xff]   ;;  %v98_v26 = vpack.c.bf16 %v70_v22, %v69_v21  ;;  %v107_v28 = vpack.c.bf16 %v88_v24, %v87_v23  ;;  %v89_v30 = vld [vmem:[%s2068_s1 + $0xd0] sm:$0xff]  ;;  %v90_v31 = vld [vmem:[%s2068_s1 + $0xd8] sm:$0xff] }
   0x8   :  { %v71_v27 = vld [vmem:[%s2068_s1 + $0x40] sm:$0xff]  ;;  %v72_v29 = vld [vmem:[%s2068_s1 + $0x48] sm:$0xff]  ;;  %367 = vmatprep.mubr.bf16.mxu0 %v1463_v25  ;;  %v73_v33 = vld [vmem:[%s2068_s1 + $0x50] sm:$0xff]  ;;  %v108_v34 = vpack.c.bf16 %v90_v31, %v89_v30 }
   0x9   :  { %1123 = vmatpush3.bf16.msra.mxu0 %v96_v13  ;;  %v99_v32 = vpack.c.bf16 %v72_v29, %v71_v27  ;;  %v74_v35 = vld [vmem:[%s2068_s1 + $0x58] sm:$0xff]  ;;  %v91_v36 = vld [vmem:[%s2068_s1 + $0xe0] sm:$0xff]  ;;  %v92_v37 = vld [vmem:[%s2068_s1 + $0xe8] sm:$0xff] }
   0xa   :  { %1124 = vmatprep.subr.bf16.mxu0 %v105_v14  ;;  %v100_v38 = vpack.c.bf16 %v74_v35, %v73_v33  ;;  %v75_v39 = vld [vmem:[%s2068_s1 + $0x60] sm:$0xff]  ;;  %v109_v40 = vpack.c.bf16 %v92_v37, %v91_v36  ;;  %v76_v41 = vld [vmem:[%s2068_s1 + $0x68] sm:$0xff]  ;;  %v93_v42 = vld [vmem:[%s2068_s1 + $0xf0] sm:$0xff] }
   0xb   :  { %v94_v43 = vld [vmem:[%s2068_s1 + $0xf8] sm:$0xff]  ;;  %v101_v44 = vpack.c.bf16 %v76_v41, %v75_v39  ;;  %v77_v45 = vld [vmem:[%s2068_s1 + $0x70] sm:$0xff]  ;;  %v1461_v49 = vld [vmem:[%s2067_s0] ss:$8 sps:$4 sm:$0xff]  }
   0xc   :  { %v110_v46 = vpack.c.bf16 %v94_v43, %v93_v42  ;;  %v78_v47 = vld [vmem:[%s2068_s1 + $0x78] sm:$0xff]  ;;  %v634_v51 = vld [vmem:[%s2070_s3] sm:$0xff]  ;;  %v635_v52 = vld [vmem:[%s2070_s3 + $0x8] sm:$0xff] }
   0xd   :  { %1125 = vmatpush3.bf16.msra.mxu0 %v97_v19  ;;  %v102_v48 = vpack.c.bf16 %v78_v47, %v77_v45  ;;  %v1464_v50 = vld [vmem:[%s2067_s0 + $0x14] ss:$8 sps:$4 sm:$0xff]   ;;  %v1394_v54 = vpack.c.bf16 %v635_v52, %v634_v51  ;;  %v638_v57 = vld [vmem:[%s2070_s3 + $0x20] sm:$0xff]  ;;  %v639_v58 = vld [vmem:[%s2070_s3 + $0x28] sm:$0xff] }
   0xe   :  { %1126 = vmatprep.subr.bf16.mxu0 %v106_v20  ;;  %v636_v53 = vld [vmem:[%s2070_s3 + $0x10] sm:$0xff]  ;;  %v637_v55 = vld [vmem:[%s2070_s3 + $0x18] sm:$0xff] }
   0xf   :  { %v1398_v56 = vpack.c.bf16 %v637_v55, %v636_v53  ;;  %1395 = vmatprep.subr.bf16.mxu1 %v1394_v54 }
  0x10   :  { %1397 = vmatpush3.bf16.msra.mxu1 %v1394_v54 }
  0x11   :  { %1127 = vmatpush3.bf16.msra.mxu0 %v98_v26 }
  0x12   :  { %1128 = vmatprep.subr.bf16.mxu0 %v107_v28 }
  0x15   :  { %1129 = vmatpush3.bf16.msra.mxu0 %v99_v32 }
  0x16   :  { %1130 = vmatprep.subr.bf16.mxu0 %v108_v34 }
  0x19   :  { %1131 = vmatpush3.bf16.msra.mxu0 %v100_v38 }
  0x1a   :  { %1132 = vmatprep.subr.bf16.mxu0 %v109_v40 }
  0x1d   :  { %1133 = vmatpush3.bf16.msra.mxu0 %v101_v44 }
  0x1e   :  { %1134 = vmatprep.subr.bf16.mxu0 %v110_v46 }
  0x21   :  { %1135 = vmatpush3.bf16.msra.mxu0 %v102_v48 }
  0x24   :  { %368 = vmatmul.mubr.bf16.vlgmr.msra.gmra.mrb[0].mxu0 %v1461_v49 }
  0x25   :  { %375 = vmatprep.mubr.bf16.mxu0 %v1464_v50 }
  0x26   :  { %11 = vsyncpa [#allocation4], 0  ;;  %1399 = vmatprep.subr.bf16.mxu1 %v1398_v56  ;;  %v1402_v59 = vpack.c.bf16 %v639_v58, %v638_v57  ;;  %v640_v60 = vld [vmem:[%s2070_s3 + $0x30] sm:$0xff]  ;;  %v641_v61 = vld [vmem:[%s2070_s3 + $0x38] sm:$0xff] }
  0x27   :  { %v1466_v62 = vld [vmem:[%s2067_s0 + $0x10] ss:$8 sps:$4 sm:$0xff]   ;;  %v1467_v63 = vld [vmem:[%s2067_s0 + $0x24] ss:$8 sps:$4 sm:$0xff]   ;;  %1401 = vmatpush3.bf16.msra.mxu1 %v1398_v56  ;;  %v1406_v0 = vpack.c.bf16 %v641_v61, %v640_v60  ;;  %v1469_v6 = vld [vmem:[%s2067_s0 + $0x20] ss:$8 sps:$4 sm:$0xff]  }
  0x28   :  { %1403 = vmatprep.subr.bf16.mxu1 %v1402_v59  ;;  %v642_v1 = vld [vmem:[%s2070_s3 + $0x40] sm:$0xff]  ;;  %v643_v2 = vld [vmem:[%s2070_s3 + $0x48] sm:$0xff]  ;;  %v644_v4 = vld [vmem:[%s2070_s3 + $0x50] sm:$0xff] }
  0x29   :  { %v1410_v3 = vpack.c.bf16 %v643_v2, %v642_v1  ;;  %v645_v5 = vld [vmem:[%s2070_s3 + $0x58] sm:$0xff]  ;;  %v1473_v10 = vld [vmem:[%s2067_s0 + $0x44] ss:$8 sps:$4 sm:$0xff]   ;;  %v1475_v11 = vld [vmem:[%s2067_s0 + $0x40] ss:$8 sps:$4 sm:$0xff]  }
  0x2a   :  { %v1470_v7 = vld [vmem:[%s2067_s0 + $0x34] ss:$8 sps:$4 sm:$0xff]   ;;  %v1414_v8 = vpack.c.bf16 %v645_v5, %v644_v4  ;;  %v1472_v9 = vld [vmem:[%s2067_s0 + $0x30] ss:$8 sps:$4 sm:$0xff]   ;;  %v1479_v14 = vld [vmem:[%s2067_s0 + $0x64] ss:$8 sps:$4 sm:$0xff]  }
  0x2b   :  { %1405 = vmatpush3.bf16.msra.mxu1 %v1402_v59  ;;  %v1476_v12 = vld [vmem:[%s2067_s0 + $0x54] ss:$8 sps:$4 sm:$0xff]   ;;  %v1478_v13 = vld [vmem:[%s2067_s0 + $0x50] ss:$8 sps:$4 sm:$0xff]   ;;  %v1481_v15 = vld [vmem:[%s2067_s0 + $0x60] ss:$8 sps:$4 sm:$0xff]  }
  0x2c   :  { %376 = vmatmul.mubr.bf16.gmra.mrb[4].mxu0 %v1466_v62  ;;  %1407 = vmatprep.subr.bf16.mxu1 %v1406_v0  ;;  %v1482_v16 = vld [vmem:[%s2067_s0 + $0x74] ss:$8 sps:$4 sm:$0xff]   ;;  %v1484_v17 = vld [vmem:[%s2067_s0 + $0x70] ss:$8 sps:$4 sm:$0xff]   ;;  %v1485_v18 = vld [vmem:[%s2067_s0 + $0x84] ss:$8 sps:$4 sm:$0xff]  }
  0x2d   :  { %383 = vmatprep.mubr.bf16.mxu0 %v1467_v63  ;;  %v1487_v19 = vld [vmem:[%s2067_s0 + $0x80] ss:$8 sps:$4 sm:$0xff]   ;;  %v1488_v20 = vld [vmem:[%s2067_s0 + $0x94] ss:$8 sps:$4 sm:$0xff]   ;;  %v1490_v21 = vld [vmem:[%s2067_s0 + $0x90] ss:$8 sps:$4 sm:$0xff]  }
  0x2e   :  { %v1491_v22 = vld [vmem:[%s2067_s0 + $0xa4] ss:$8 sps:$4 sm:$0xff]   ;;  %v1493_v23 = vld [vmem:[%s2067_s0 + $0xa0] ss:$8 sps:$4 sm:$0xff]   ;;  %v1494_v24 = vld [vmem:[%s2067_s0 + $0xb4] ss:$8 sps:$4 sm:$0xff]  }
  0x2f   :  { %1409 = vmatpush3.bf16.msra.mxu1 %v1406_v0  ;;  %v646_v25 = vld [vmem:[%s2070_s3 + $0x60] sm:$0xff]  ;;  %v647_v26 = vld [vmem:[%s2070_s3 + $0x68] sm:$0xff]  ;;  %v1496_v28 = vld [vmem:[%s2067_s0 + $0xb0] ss:$8 sps:$4 sm:$0xff]  }
  0x30   :  { %1411 = vmatprep.subr.bf16.mxu1 %v1410_v3  ;;  %v1418_v27 = vpack.c.bf16 %v647_v26, %v646_v25  ;;  %v648_v29 = vld [vmem:[%s2070_s3 + $0x70] sm:$0xff]  ;;  %v649_v30 = vld [vmem:[%s2070_s3 + $0x78] sm:$0xff]  ;;  %v1497_v31 = vld [vmem:[%s2067_s0 + $0xc4] ss:$8 sps:$4 sm:$0xff]  }
  0x31   :  { %v1422_v32 = vpack.c.bf16 %v649_v30, %v648_v29  ;;  %v1499_v33 = vld [vmem:[%s2067_s0 + $0xc0] ss:$8 sps:$4 sm:$0xff]   ;;  %v1500_v34 = vld [vmem:[%s2067_s0 + $0xd4] ss:$8 sps:$4 sm:$0xff]   ;;  %v1502_v35 = vld [vmem:[%s2067_s0 + $0xd0] ss:$8 sps:$4 sm:$0xff]  }
  0x32   :  { %v1503_v36 = vld [vmem:[%s2067_s0 + $0xe4] ss:$8 sps:$4 sm:$0xff]   ;;  %v1505_v37 = vld [vmem:[%s2067_s0 + $0xe0] ss:$8 sps:$4 sm:$0xff]   ;;  %v1506_v38 = vld [vmem:[%s2067_s0 + $0xf4] ss:$8 sps:$4 sm:$0xff]  }
  0x33   :  { %1413 = vmatpush3.bf16.msra.mxu1 %v1410_v3  ;;  %v1508_v39 = vld [vmem:[%s2067_s0 + $0xf0] ss:$8 sps:$4 sm:$0xff]   ;;  %v1814_v42 = vld [vmem:[%s2069_s2] ss:$0 sm:$0xff] }
  0x34   :  { %384 = vmatmul.mubr.bf16.gmra.mrb[8].mxu0 %v1469_v6  ;;  %1415 = vmatprep.subr.bf16.mxu1 %v1414_v8 }
  0x35   :  { %391 = vmatprep.mubr.bf16.mxu0 %v1470_v7 }
  0x37   :  { %1417 = vmatpush3.bf16.msra.mxu1 %v1414_v8 }
  0x38   :  { %1419 = vmatprep.subr.bf16.mxu1 %v1418_v27 }
  0x3b   :  { %1421 = vmatpush3.bf16.msra.mxu1 %v1418_v27 }
  0x3c   :  { %392 = vmatmul.mubr.bf16.gmra.mrb[12].mxu0 %v1472_v9  ;;  %1423 = vmatprep.subr.bf16.mxu1 %v1422_v32 }
  0x3d   :  { %399 = vmatprep.mubr.bf16.mxu0 %v1473_v10 }
  0x3f   :  { %1425 = vmatpush3.bf16.msra.mxu1 %v1422_v32 }
  0x44   :  { %400 = vmatmul.mubr.bf16.gmra.mrb[16].mxu0 %v1475_v11 }
  0x45   :  { %407 = vmatprep.mubr.bf16.mxu0 %v1476_v12 }
  0x4c   :  { %408 = vmatmul.mubr.bf16.gmra.mrb[20].mxu0 %v1478_v13 }
  0x4d   :  { %415 = vmatprep.mubr.bf16.mxu0 %v1479_v14 }
  0x54   :  { %416 = vmatmul.mubr.bf16.gmra.mrb[24].mxu0 %v1481_v15 }
  0x55   :  { %423 = vmatprep.mubr.bf16.mxu0 %v1482_v16 }
  0x5c   :  { %424 = vmatmul.mubr.bf16.gmra.mrb[28].mxu0 %v1484_v17 }
  0x5d   :  { %431 = vmatprep.mubr.bf16.mxu0 %v1485_v18 }
  0x64   :  { %432 = vmatmul.mubr.bf16.gmra.mrb[32].mxu0 %v1487_v19 }
  0x65   :  { %439 = vmatprep.mubr.bf16.mxu0 %v1488_v20 }
  0x6c   :  { %440 = vmatmul.mubr.bf16.gmra.mrb[36].mxu0 %v1490_v21 }
  0x6d   :  { %447 = vmatprep.mubr.bf16.mxu0 %v1491_v22 }
  0x74   :  { %448 = vmatmul.mubr.bf16.gmra.mrb[40].mxu0 %v1493_v23 }
  0x75   :  { %455 = vmatprep.mubr.bf16.mxu0 %v1494_v24 }
  0x7c   :  { %456 = vmatmul.mubr.bf16.gmra.mrb[44].mxu0 %v1496_v28 }
  0x7d   :  { %463 = vmatprep.mubr.bf16.mxu0 %v1497_v31 }
  0x84   :  { %464 = vmatmul.mubr.bf16.gmra.mrb[48].mxu0 %v1499_v33 }
  0x85   :  { %471 = vmatprep.mubr.bf16.mxu0 %v1500_v34 }
  0x8c   :  { %472 = vmatmul.mubr.bf16.gmra.mrb[52].mxu0 %v1502_v35 }
  0x8d   :  { %479 = vmatprep.mubr.bf16.mxu0 %v1503_v36 }
  0x94   :  { %480 = vmatmul.mubr.bf16.gmra.mrb[56].mxu0 %v1505_v37 }
  0x95   :  { %487 = vmatprep.mubr.bf16.mxu0 %v1506_v38 }
  0x9c   :  { %488 = vmatmul.mubr.bf16.gmra.mrb[60].mxu0 %v1508_v39 }
  0xf7   :  { %v1136_v40 = vpop.f32.mrb[0].mxu0 }
  0xf8   :  { %v1137_v41 = vpop.f32.mrb[1].mxu0 }
  0xf9   :  { %v1138_v43 = vadd.f32 %v1137_v41, %v1136_v40  ;;  %v1139_v44 = vpop.f32.mrb[2].mxu0 }
  0xfa   :  { %v1140_v45 = vpop.f32.mrb[3].mxu0 }
  0xfb   :  { %v1141_v46 = vadd.f32 %v1140_v45, %v1139_v44  ;;  %v602_v47 = vadd.f32 %v1138_v43, %v1814_v42 }
  0xfd   :  { %v603_v48 = vadd.f32 %v1141_v46, %v1814_v42  ;;  %1346 = vmatprep.mubr.f32.mxu1 %v602_v47 }
  0xff   :  { %v1142_v49 = vpop.f32.mrb[4].mxu0  ;;  %1347 = vmatmul.mubr.f32.vlgmr.msra.gmra.mrb[0].mxu1 %v603_v48 }
 0x100   :  { %v1143_v50 = vpop.f32.mrb[5].mxu0 }
 0x101   :  { %v1144_v51 = vadd.f32 %v1143_v50, %v1142_v49  ;;  %v1145_v52 = vpop.f32.mrb[6].mxu0 }
 0x102   :  { %v1146_v53 = vpop.f32.mrb[7].mxu0 }
 0x103   :  { %v604_v54 = vadd.f32 %v1144_v51, %v1814_v42  ;;  %v1147_v55 = vadd.f32 %v1146_v53, %v1145_v52 }
 0x105   :  { %v605_v56 = vadd.f32 %v1147_v55, %v1814_v42  ;;  %1349 = vmatprep.mubr.f32.mxu1 %v604_v54 }
 0x107   :  { %v1148_v57 = vpop.f32.mrb[8].mxu0  ;;  %1350 = vmatmul.mubr.f32.gmra.mrb[2].mxu1 %v605_v56 }
 0x108   :  { %v1149_v58 = vpop.f32.mrb[9].mxu0 }
 0x109   :  { %v1150_v59 = vadd.f32 %v1149_v58, %v1148_v57  ;;  %v1151_v60 = vpop.f32.mrb[10].mxu0 }
 0x10a   :  { %v1152_v61 = vpop.f32.mrb[11].mxu0 }
 0x10b   :  { %v606_v62 = vadd.f32 %v1150_v59, %v1814_v42  ;;  %v1153_v63 = vadd.f32 %v1152_v61, %v1151_v60 }
 0x10d   :  { %v607_v0 = vadd.f32 %v1153_v63, %v1814_v42  ;;  %1352 = vmatprep.mubr.f32.mxu1 %v606_v62 }
 0x10f   :  { %v1154_v1 = vpop.f32.mrb[12].mxu0  ;;  %1353 = vmatmul.mubr.f32.gmra.mrb[4].mxu1 %v607_v0 }
 0x110   :  { %v1155_v2 = vpop.f32.mrb[13].mxu0 }
 0x111   :  { %v1156_v3 = vadd.f32 %v1155_v2, %v1154_v1  ;;  %v1157_v4 = vpop.f32.mrb[14].mxu0 }
 0x112   :  { %v1158_v5 = vpop.f32.mrb[15].mxu0 }
 0x113   :  { %v608_v6 = vadd.f32 %v1156_v3, %v1814_v42  ;;  %v1159_v7 = vadd.f32 %v1158_v5, %v1157_v4 }
 0x115   :  { %v609_v8 = vadd.f32 %v1159_v7, %v1814_v42  ;;  %1355 = vmatprep.mubr.f32.mxu1 %v608_v6 }
 0x117   :  { %v1160_v9 = vpop.f32.mrb[16].mxu0  ;;  %1356 = vmatmul.mubr.f32.gmra.mrb[6].mxu1 %v609_v8 }
 0x118   :  { %v1161_v10 = vpop.f32.mrb[17].mxu0 }
 0x119   :  { %v1162_v11 = vadd.f32 %v1161_v10, %v1160_v9  ;;  %v1163_v12 = vpop.f32.mrb[18].mxu0 }
 0x11a   :  { %v1164_v13 = vpop.f32.mrb[19].mxu0 }
 0x11b   :  { %v610_v14 = vadd.f32 %v1162_v11, %v1814_v42  ;;  %v1165_v15 = vadd.f32 %v1164_v13, %v1163_v12 }
 0x11d   :  { %v611_v16 = vadd.f32 %v1165_v15, %v1814_v42  ;;  %1358 = vmatprep.mubr.f32.mxu1 %v610_v14 }
 0x11f   :  { %v1166_v17 = vpop.f32.mrb[20].mxu0  ;;  %1359 = vmatmul.mubr.f32.gmra.mrb[8].mxu1 %v611_v16 }
 0x120   :  { %v1167_v18 = vpop.f32.mrb[21].mxu0 }
 0x121   :  { %v1168_v19 = vadd.f32 %v1167_v18, %v1166_v17  ;;  %v1169_v20 = vpop.f32.mrb[22].mxu0 }
 0x122   :  { %v1170_v21 = vpop.f32.mrb[23].mxu0 }
 0x123   :  { %v612_v22 = vadd.f32 %v1168_v19, %v1814_v42  ;;  %v1171_v23 = vadd.f32 %v1170_v21, %v1169_v20 }
 0x125   :  { %v613_v24 = vadd.f32 %v1171_v23, %v1814_v42  ;;  %1361 = vmatprep.mubr.f32.mxu1 %v612_v22 }
 0x127   :  { %v1172_v25 = vpop.f32.mrb[24].mxu0  ;;  %1362 = vmatmul.mubr.f32.gmra.mrb[10].mxu1 %v613_v24 }
 0x128   :  { %v1173_v26 = vpop.f32.mrb[25].mxu0 }
 0x129   :  { %v1174_v27 = vadd.f32 %v1173_v26, %v1172_v25  ;;  %v1175_v28 = vpop.f32.mrb[26].mxu0 }
 0x12a   :  { %v1176_v29 = vpop.f32.mrb[27].mxu0 }
 0x12b   :  { %v614_v30 = vadd.f32 %v1174_v27, %v1814_v42  ;;  %v1177_v31 = vadd.f32 %v1176_v29, %v1175_v28 }
 0x12d   :  { %v615_v32 = vadd.f32 %v1177_v31, %v1814_v42  ;;  %1364 = vmatprep.mubr.f32.mxu1 %v614_v30 }
 0x12f   :  { %v1178_v33 = vpop.f32.mrb[28].mxu0  ;;  %1365 = vmatmul.mubr.f32.gmra.mrb[12].mxu1 %v615_v32 }
 0x130   :  { %v1179_v34 = vpop.f32.mrb[29].mxu0 }
 0x131   :  { %v1180_v35 = vadd.f32 %v1179_v34, %v1178_v33  ;;  %v1181_v36 = vpop.f32.mrb[30].mxu0 }
 0x132   :  { %v1182_v37 = vpop.f32.mrb[31].mxu0 }
 0x133   :  { %v616_v38 = vadd.f32 %v1180_v35, %v1814_v42  ;;  %v1183_v39 = vadd.f32 %v1182_v37, %v1181_v36 }
 0x135   :  { %v617_v40 = vadd.f32 %v1183_v39, %v1814_v42  ;;  %1367 = vmatprep.mubr.f32.mxu1 %v616_v38 }
 0x137   :  { %v1184_v41 = vpop.f32.mrb[32].mxu0  ;;  %1368 = vmatmul.mubr.f32.gmra.mrb[14].mxu1 %v617_v40 }
 0x138   :  { %v1185_v43 = vpop.f32.mrb[33].mxu0 }
 0x139   :  { %v1186_v44 = vadd.f32 %v1185_v43, %v1184_v41  ;;  %v1187_v45 = vpop.f32.mrb[34].mxu0  ;;  %v1851_v43 = vld [vmem:[%s2071_s4] ss:$0 sm:$0xff] }
 0x13a   :  { %v1188_v46 = vpop.f32.mrb[35].mxu0 }
 0x13b   :  { %v618_v47 = vadd.f32 %v1186_v44, %v1814_v42  ;;  %v1189_v48 = vadd.f32 %v1188_v46, %v1187_v45  ;;  %v883_v45 = vld [vmem:[%s2072_s5 + $0x8] sm:$0xff] }
 0x13d   :  { %v619_v49 = vadd.f32 %v1189_v48, %v1814_v42  ;;  %1370 = vmatprep.mubr.f32.mxu1 %v618_v47  ;;  %v882_v48 = vld [vmem:[%s2072_s5] sm:$0xff] }
 0x13f   :  { %v1190_v50 = vpop.f32.mrb[36].mxu0  ;;  %1371 = vmatmul.mubr.f32.gmra.mrb[16].mxu1 %v619_v49 }
 0x140   :  { %v1191_v51 = vpop.f32.mrb[37].mxu0 }
 0x141   :  { %v1192_v52 = vadd.f32 %v1191_v51, %v1190_v50  ;;  %v1193_v53 = vpop.f32.mrb[38].mxu0  ;;  %v1533_v51 = vmov 1.0  }
 0x142   :  { %v1194_v54 = vpop.f32.mrb[39].mxu0 }
 0x143   :  { %v620_v55 = vadd.f32 %v1192_v52, %v1814_v42  ;;  %v1195_v56 = vadd.f32 %v1194_v54, %v1193_v53 }
 0x145   :  { %v621_v57 = vadd.f32 %v1195_v56, %v1814_v42  ;;  %1373 = vmatprep.mubr.f32.mxu1 %v620_v55  ;;  %v885_v56 = vld [vmem:[%s2072_s5 + $0x18] sm:$0xff] }
 0x147   :  { %v1196_v58 = vpop.f32.mrb[40].mxu0  ;;  %1374 = vmatmul.mubr.f32.gmra.mrb[18].mxu1 %v621_v57 }
 0x148   :  { %v1197_v59 = vpop.f32.mrb[41].mxu0 }
 0x149   :  { %v1198_v60 = vadd.f32 %v1197_v59, %v1196_v58  ;;  %v1199_v61 = vpop.f32.mrb[42].mxu0  ;;  %v884_v59 = vld [vmem:[%s2072_s5 + $0x10] sm:$0xff] }
 0x14a   :  { %v1200_v62 = vpop.f32.mrb[43].mxu0 }
 0x14b   :  { %v622_v63 = vadd.f32 %v1198_v60, %v1814_v42  ;;  %v1201_v0 = vadd.f32 %v1200_v62, %v1199_v61 }
 0x14d   :  { %v623_v1 = vadd.f32 %v1201_v0, %v1814_v42  ;;  %1376 = vmatprep.mubr.f32.mxu1 %v622_v63 }
 0x14f   :  { %v1202_v2 = vpop.f32.mrb[44].mxu0  ;;  %1377 = vmatmul.mubr.f32.gmra.mrb[20].mxu1 %v623_v1 }
 0x150   :  { %v1203_v3 = vpop.f32.mrb[45].mxu0 }
 0x151   :  { %v1204_v4 = vadd.f32 %v1203_v3, %v1202_v2  ;;  %v1205_v5 = vpop.f32.mrb[46].mxu0  ;;  %v887_v3 = vld [vmem:[%s2072_s5 + $0x28] sm:$0xff] }
 0x152   :  { %v1206_v6 = vpop.f32.mrb[47].mxu0 }
 0x153   :  { %v624_v7 = vadd.f32 %v1204_v4, %v1814_v42  ;;  %v1207_v8 = vadd.f32 %v1206_v6, %v1205_v5  ;;  %v886_v6 = vld [vmem:[%s2072_s5 + $0x20] sm:$0xff] }
 0x155   :  { %v625_v9 = vadd.f32 %v1207_v8, %v1814_v42  ;;  %1379 = vmatprep.mubr.f32.mxu1 %v624_v7 }
 0x157   :  { %v1208_v10 = vpop.f32.mrb[48].mxu0  ;;  %1380 = vmatmul.mubr.f32.gmra.mrb[22].mxu1 %v625_v9 }
 0x158   :  { %v1209_v11 = vpop.f32.mrb[49].mxu0 }
 0x159   :  { %v1210_v12 = vadd.f32 %v1209_v11, %v1208_v10  ;;  %v1211_v13 = vpop.f32.mrb[50].mxu0 }
 0x15a   :  { %v1212_v14 = vpop.f32.mrb[51].mxu0 }
 0x15b   :  { %v626_v15 = vadd.f32 %v1210_v12, %v1814_v42  ;;  %v1213_v16 = vadd.f32 %v1212_v14, %v1211_v13  ;;  %v889_v14 = vld [vmem:[%s2072_s5 + $0x38] sm:$0xff] }
 0x15d   :  { %v627_v17 = vadd.f32 %v1213_v16, %v1814_v42  ;;  %1382 = vmatprep.mubr.f32.mxu1 %v626_v15 }
 0x15f   :  { %v1214_v18 = vpop.f32.mrb[52].mxu0  ;;  %1383 = vmatmul.mubr.f32.gmra.mrb[24].mxu1 %v627_v17  ;;  %v888_v17 = vld [vmem:[%s2072_s5 + $0x30] sm:$0xff] }
 0x160   :  { %v1215_v19 = vpop.f32.mrb[53].mxu0 }
 0x161   :  { %v1216_v20 = vadd.f32 %v1215_v19, %v1214_v18  ;;  %v1217_v21 = vpop.f32.mrb[54].mxu0 }
 0x162   :  { %v1218_v22 = vpop.f32.mrb[55].mxu0 }
 0x163   :  { %v628_v23 = vadd.f32 %v1216_v20, %v1814_v42  ;;  %v1219_v24 = vadd.f32 %v1218_v22, %v1217_v21 }
 0x165   :  { %v629_v25 = vadd.f32 %v1219_v24, %v1814_v42  ;;  %1385 = vmatprep.mubr.f32.mxu1 %v628_v23 }
 0x167   :  { %v1220_v26 = vpop.f32.mrb[56].mxu0  ;;  %1386 = vmatmul.mubr.f32.gmra.mrb[26].mxu1 %v629_v25  ;;  %v891_v25 = vld [vmem:[%s2072_s5 + $0x48] sm:$0xff] }
 0x168   :  { %v1221_v27 = vpop.f32.mrb[57].mxu0 }
 0x169   :  { %v1222_v28 = vadd.f32 %v1221_v27, %v1220_v26  ;;  %v1223_v29 = vpop.f32.mrb[58].mxu0 }
 0x16a   :  { %v1224_v30 = vpop.f32.mrb[59].mxu0 }
 0x16b   :  { %v630_v31 = vadd.f32 %v1222_v28, %v1814_v42  ;;  %v1225_v32 = vadd.f32 %v1224_v30, %v1223_v29  ;;  %v890_v28 = vld [vmem:[%s2072_s5 + $0x40] sm:$0xff] }
 0x16d   :  { %v631_v33 = vadd.f32 %v1225_v32, %v1814_v42  ;;  %1388 = vmatprep.mubr.f32.mxu1 %v630_v31 }
 0x16f   :  { %v1226_v34 = vpop.f32.mrb[60].mxu0  ;;  %1389 = vmatmul.mubr.f32.gmra.mrb[28].mxu1 %v631_v33 }
 0x170   :  { %v1227_v35 = vpop.f32.mrb[61].mxu0 }
 0x171   :  { %v1228_v36 = vadd.f32 %v1227_v35, %v1226_v34  ;;  %v1229_v37 = vpop.f32.mrb[62].mxu0 }
 0x172   :  { %v1230_v38 = vpop.f32.mrb[63].mxu0 }
 0x173   :  { %v632_v39 = vadd.f32 %v1228_v36, %v1814_v42  ;;  %v1231_v40 = vadd.f32 %v1230_v38, %v1229_v37  ;;  %v893_v36 = vld [vmem:[%s2072_s5 + $0x58] sm:$0xff] }
 0x175   :  { %v633_v41 = vadd.f32 %v1231_v40, %v1814_v42  ;;  %1391 = vmatprep.mubr.f32.mxu1 %v632_v39  ;;  %v892_v39 = vld [vmem:[%s2072_s5 + $0x50] sm:$0xff] }
 0x177   :  { %1392 = vmatmul.mubr.f32.gmra.mrb[30].mxu1 %v633_v41 }
 0x178   :  { %1312 = vmatprep.mubr.f32.mxu1 %v1533_v51 }
 0x1d2   :  { %v1348_v44 = vpop.f32.mrb[0].mxu1 }
 0x1d3   :  { %v729_v46 = vadd.f32 %v1348_v44, %v1851_v43  ;;  %v723_v47 = vpop.f32.mrb[1].mxu1 }
 0x1d4   :  { %v724_v42 = vadd.f32 %v1851_v43, %v723_v47 }
 0x1d5   :  { %v915_v49 = vsub.f32 %v883_v45, %v729_v46 }
 0x1d6   :  { %v914_v50 = vsub.f32 %v882_v48, %v724_v42  ;;  %v895_v42 = vld [vmem:[%s2072_s5 + $0x68] sm:$0xff] }
 0x1d7   :  { %v1862_v52 = vmul.f32 %v915_v49, %v915_v49 }
 0x1d8   :  { %v1864_v53 = vmul.f32 %v914_v50, %v914_v50 }
 0x1da   :  { %v1428_v54 = vpack.c.bf16 %v1862_v52, %v1864_v53  ;;  %v1351_v55 = vpop.f32.mrb[2].mxu1 }
 0x1db   :  { %v739_v57 = vadd.f32 %v1351_v55, %v1851_v43  ;;  %v733_v58 = vpop.f32.mrb[3].mxu1  ;;  %v894_v55 = vld [vmem:[%s2072_s5 + $0x60] sm:$0xff] }
 0x1dc   :  { %v734_v60 = vadd.f32 %v1851_v43, %v733_v58 }
 0x1dd   :  { %v917_v61 = vsub.f32 %v885_v56, %v739_v57 }
 0x1de   :  { %v916_v62 = vsub.f32 %v884_v59, %v734_v60 }
 0x1df   :  { %v1876_v63 = vmul.f32 %v917_v61, %v917_v61 }
 0x1e0   :  { %v1878_v0 = vmul.f32 %v916_v62, %v916_v62 }
 0x1e2   :  { %v1432_v1 = vpack.c.bf16 %v1876_v63, %v1878_v0  ;;  %v1354_v2 = vpop.f32.mrb[4].mxu1 }
 0x1e3   :  { %v749_v4 = vadd.f32 %v1354_v2, %v1851_v43  ;;  %v743_v5 = vpop.f32.mrb[5].mxu1  ;;  %v897_v2 = vld [vmem:[%s2072_s5 + $0x78] sm:$0xff] }
 0x1e4   :  { %v744_v7 = vadd.f32 %v1851_v43, %v743_v5  ;;  %v896_v5 = vld [vmem:[%s2072_s5 + $0x70] sm:$0xff] }
 0x1e5   :  { %v919_v8 = vsub.f32 %v887_v3, %v749_v4 }
 0x1e6   :  { %v918_v9 = vsub.f32 %v886_v6, %v744_v7 }
 0x1e7   :  { %v1890_v10 = vmul.f32 %v919_v8, %v919_v8 }
 0x1e8   :  { %v1892_v11 = vmul.f32 %v918_v9, %v918_v9 }
 0x1ea   :  { %v1436_v12 = vpack.c.bf16 %v1890_v10, %v1892_v11  ;;  %v1357_v13 = vpop.f32.mrb[6].mxu1 }
 0x1eb   :  { %v759_v15 = vadd.f32 %v1357_v13, %v1851_v43  ;;  %v753_v16 = vpop.f32.mrb[7].mxu1 }
 0x1ec   :  { %v754_v18 = vadd.f32 %v1851_v43, %v753_v16  ;;  %v899_v16 = vld [vmem:[%s2072_s5 + $0x88] sm:$0xff] }
 0x1ed   :  { %v921_v19 = vsub.f32 %v889_v14, %v759_v15 }
 0x1ee   :  { %v920_v20 = vsub.f32 %v888_v17, %v754_v18 }
 0x1ef   :  { %v1904_v21 = vmul.f32 %v921_v19, %v921_v19  ;;  %v898_v19 = vld [vmem:[%s2072_s5 + $0x80] sm:$0xff] }
 0x1f0   :  { %v1906_v22 = vmul.f32 %v920_v20, %v920_v20 }
 0x1f2   :  { %v1440_v23 = vpack.c.bf16 %v1904_v21, %v1906_v22  ;;  %v1360_v24 = vpop.f32.mrb[8].mxu1 }
 0x1f3   :  { %v769_v26 = vadd.f32 %v1360_v24, %v1851_v43  ;;  %v763_v27 = vpop.f32.mrb[9].mxu1 }
 0x1f4   :  { %v764_v29 = vadd.f32 %v1851_v43, %v763_v27 }
 0x1f5   :  { %v923_v30 = vsub.f32 %v891_v25, %v769_v26 }
 0x1f6   :  { %v922_v31 = vsub.f32 %v890_v28, %v764_v29  ;;  %v901_v29 = vld [vmem:[%s2072_s5 + $0x98] sm:$0xff] }
 0x1f7   :  { %v1918_v32 = vmul.f32 %v923_v30, %v923_v30 }
 0x1f8   :  { %v1920_v33 = vmul.f32 %v922_v31, %v922_v31 }
 0x1fa   :  { %v1444_v34 = vpack.c.bf16 %v1918_v32, %v1920_v33  ;;  %v1363_v35 = vpop.f32.mrb[10].mxu1 }
 0x1fb   :  { %v779_v37 = vadd.f32 %v1363_v35, %v1851_v43  ;;  %v773_v38 = vpop.f32.mrb[11].mxu1 }
 0x1fc   :  { %v774_v40 = vadd.f32 %v1851_v43, %v773_v38 }
 0x1fd   :  { %v925_v41 = vsub.f32 %v893_v36, %v779_v37  ;;  %v900_v36 = vld [vmem:[%s2072_s5 + $0x90] sm:$0xff] }
 0x1fe   :  { %v924_v44 = vsub.f32 %v892_v39, %v774_v40 }
 0x1ff   :  { %v1932_v45 = vmul.f32 %v925_v41, %v925_v41 }
 0x200   :  { %v1934_v46 = vmul.f32 %v924_v44, %v924_v44 }
 0x202   :  { %v1448_v47 = vpack.c.bf16 %v1932_v45, %v1934_v46  ;;  %v1366_v48 = vpop.f32.mrb[12].mxu1 }
 0x203   :  { %v789_v49 = vadd.f32 %v1366_v48, %v1851_v43  ;;  %v783_v50 = vpop.f32.mrb[13].mxu1  ;;  %v903_v48 = vld [vmem:[%s2072_s5 + $0xa8] sm:$0xff] }
 0x204   :  { %v784_v56 = vadd.f32 %v1851_v43, %v783_v50 }
 0x205   :  { %v927_v57 = vsub.f32 %v895_v42, %v789_v49 }
 0x206   :  { %v926_v58 = vsub.f32 %v894_v55, %v784_v56  ;;  %v902_v55 = vld [vmem:[%s2072_s5 + $0xa0] sm:$0xff] }
 0x207   :  { %v1946_v59 = vmul.f32 %v927_v57, %v927_v57 }
 0x208   :  { %v1948_v60 = vmul.f32 %v926_v58, %v926_v58 }
 0x20a   :  { %v1452_v61 = vpack.c.bf16 %v1946_v59, %v1948_v60  ;;  %v1369_v62 = vpop.f32.mrb[14].mxu1 }
 0x20b   :  { %v799_v3 = vadd.f32 %v1369_v62, %v1851_v43  ;;  %v793_v4 = vpop.f32.mrb[15].mxu1  ;;  %v905_v62 = vld [vmem:[%s2072_s5 + $0xb8] sm:$0xff] }
 0x20c   :  { %v794_v6 = vadd.f32 %v1851_v43, %v793_v4 }
 0x20d   :  { %v929_v7 = vsub.f32 %v897_v2, %v799_v3 }
 0x20e   :  { %v928_v8 = vsub.f32 %v896_v5, %v794_v6  ;;  %v904_v5 = vld [vmem:[%s2072_s5 + $0xb0] sm:$0xff] }
 0x20f   :  { %v1960_v9 = vmul.f32 %v929_v7, %v929_v7 }
 0x210   :  { %v1962_v13 = vmul.f32 %v928_v8, %v928_v8 }
 0x212   :  { %v1456_v14 = vpack.c.bf16 %v1960_v9, %v1962_v13  ;;  %v1372_v15 = vpop.f32.mrb[16].mxu1 }
 0x213   :  { %v809_v17 = vadd.f32 %v1372_v15, %v1851_v43  ;;  %v803_v18 = vpop.f32.mrb[17].mxu1  ;;  %v907_v15 = vld [vmem:[%s2072_s5 + $0xc8] sm:$0xff] }
 0x214   :  { %v804_v20 = vadd.f32 %v1851_v43, %v803_v18 }
 0x215   :  { %v931_v24 = vsub.f32 %v899_v16, %v809_v17 }
 0x216   :  { %v930_v25 = vsub.f32 %v898_v19, %v804_v20  ;;  %v906_v19 = vld [vmem:[%s2072_s5 + $0xc0] sm:$0xff] }
 0x217   :  { %v963_v26 = vmul.f32 %v931_v24, %v931_v24 }
 0x218   :  { %v962_v27 = vmul.f32 %v930_v25, %v930_v25 }
 0x21a   :  { %v1375_v28 = vpop.f32.mrb[18].mxu1  ;;  %v1426_v30 = vpack.c.bf16 %v963_v26, %v962_v27  ;;  %v909_v26 = vld [vmem:[%s2072_s5 + $0xd8] sm:$0xff] }
 0x21b   :  { %v819_v31 = vadd.f32 %v1375_v28, %v1851_v43  ;;  %v813_v35 = vpop.f32.mrb[19].mxu1 }
 0x21c   :  { %v814_v37 = vadd.f32 %v1851_v43, %v813_v35  ;;  %1427 = vmatprep.subr.bf16.mxu1 %v1426_v30  ;;  %v908_v30 = vld [vmem:[%s2072_s5 + $0xd0] sm:$0xff] }
 0x21d   :  { %v933_v38 = vsub.f32 %v901_v29, %v819_v31  ;;  %1429 = vmatpush3.bf16.xpose.msra.mxu1 %v1428_v54 }
 0x21e   :  { %v932_v39 = vsub.f32 %v900_v36, %v814_v37  ;;  %v911_v37 = vld [vmem:[%s2072_s5 + $0xe8] sm:$0xff] }
 0x21f   :  { %v965_v40 = vmul.f32 %v933_v38, %v933_v38 }
 0x220   :  { %v964_v41 = vmul.f32 %v932_v39, %v932_v39 }
 0x222   :  { %v1378_v44 = vpop.f32.mrb[20].mxu1  ;;  %v1430_v42 = vpack.c.bf16 %v965_v40, %v964_v41  ;;  %v910_v41 = vld [vmem:[%s2072_s5 + $0xe0] sm:$0xff] }
 0x223   :  { %v829_v49 = vadd.f32 %v1378_v44, %v1851_v43  ;;  %v823_v50 = vpop.f32.mrb[21].mxu1 }
 0x224   :  { %v824_v56 = vadd.f32 %v1851_v43, %v823_v50  ;;  %1431 = vmatprep.subr.bf16.mxu1 %v1430_v42 }
 0x225   :  { %v935_v52 = vsub.f32 %v903_v48, %v829_v49  ;;  %1433 = vmatpush3.bf16.xpose.msra.mxu1 %v1432_v1  ;;  %v913_v49 = vld [vmem:[%s2072_s5 + $0xf8] sm:$0xff] }
 0x226   :  { %v934_v53 = vsub.f32 %v902_v55, %v824_v56 }
 0x227   :  { %v967_v54 = vmul.f32 %v935_v52, %v935_v52  ;;  %v912_v52 = vld [vmem:[%s2072_s5 + $0xf0] sm:$0xff]  ;;  %s1535_s5 = smov [#allocation3]  }
 0x228   :  { %v966_v57 = vmul.f32 %v934_v53, %v934_v53  ;;  %s1078_s15 = sshll.u32 %s1535_s5, 4  ;;  %s1079_s15 = int_to_ptr.vmem [resolvable:$true] %s1078_s15 }
 0x229   :  { %s1509_s16 = scalar_lea.vmem %s1079_s15, 32  ;;  %p1514_p1 = scmp.lt.s32.totalorder %s1079_s15, %s1079_s15 }
 0x22a   :  { %v1381_v58 = vpop.f32.mrb[22].mxu1  ;;  %v1434_v2 = vpack.c.bf16 %v967_v54, %v966_v57  ;;  %p1510_p0 = scmp.ne.s32.totalorder %s1079_s15, %s1509_s16  ;;  %p1515_p2 = scmp.lt.s32.totalorder %s1509_s16, %s1509_s16 }
 0x22b   :  { %v839_v3 = vadd.f32 %v1381_v58, %v1851_v43  ;;  %v833_v4 = vpop.f32.mrb[23].mxu1  ;;  %v1534_v58 = vmov 1966171168  }
 0x22c   :  { %v834_v6 = vadd.f32 %v1851_v43, %v833_v4  ;;  %1435 = vmatprep.subr.bf16.mxu1 %v1434_v2  ;;  %p1516_p3 = por %p1515_p2, %p1514_p1 }
 0x22d   :  { %v937_v63 = vsub.f32 %v905_v62, %v839_v3  ;;  %1437 = vmatpush3.bf16.xpose.msra.mxu1 %v1436_v12  ;;  %v1053_v62 = vunpack.c.l.s4 %v1534_v58 }
 0x22e   :  { %v936_v0 = vsub.f32 %v904_v5, %v834_v6  ;;  %p1517_p4 = pnand %p1516_p3, %p1510_p0 }
 0x22f   :  { %v969_v1 = vmul.f32 %v937_v63, %v937_v63  ;;  %v1054_v2 = vunpack.c.0.s8 %v1053_v62 }
 0x230   :  { %v968_v7 = vmul.f32 %v936_v0, %v936_v0 }
 0x232   :  { %v1384_v8 = vpop.f32.mrb[24].mxu1  ;;  %v1438_v16 = vpack.c.bf16 %v969_v1, %v968_v7 }
 0x233   :  { %v849_v17 = vadd.f32 %v1384_v8, %v1851_v43  ;;  %v843_v18 = vpop.f32.mrb[25].mxu1 }
 0x234   :  { %v844_v20 = vadd.f32 %v1851_v43, %v843_v18  ;;  %1439 = vmatprep.subr.bf16.mxu1 %v1438_v16 }
 0x235   :  { %v939_v10 = vsub.f32 %v907_v15, %v849_v17  ;;  %1441 = vmatpush3.bf16.xpose.msra.mxu1 %v1440_v23 }
 0x236   :  { %v938_v11 = vsub.f32 %v906_v19, %v844_v20 }
 0x237   :  { %v971_v12 = vmul.f32 %v939_v10, %v939_v10 }
 0x238   :  { %v970_v24 = vmul.f32 %v938_v11, %v938_v11 }
 0x23a   :  { %v1387_v25 = vpop.f32.mrb[26].mxu1  ;;  %v1442_v27 = vpack.c.bf16 %v971_v12, %v970_v24 }
 0x23b   :  { %v859_v28 = vadd.f32 %v1387_v25, %v1851_v43  ;;  %v853_v29 = vpop.f32.mrb[27].mxu1 }
 0x23c   :  { %v854_v31 = vadd.f32 %v1851_v43, %v853_v29  ;;  %1443 = vmatprep.subr.bf16.mxu1 %v1442_v27 }
 0x23d   :  { %v941_v21 = vsub.f32 %v909_v26, %v859_v28  ;;  %1445 = vmatpush3.bf16.xpose.msra.mxu1 %v1444_v34 }
 0x23e   :  { %v940_v22 = vsub.f32 %v908_v30, %v854_v31 }
 0x23f   :  { %v973_v23 = vmul.f32 %v941_v21, %v941_v21 }
 0x240   :  { %v972_v35 = vmul.f32 %v940_v22, %v940_v22 }
 0x242   :  { %v1390_v36 = vpop.f32.mrb[28].mxu1  ;;  %v1446_v38 = vpack.c.bf16 %v973_v23, %v972_v35 }
 0x243   :  { %v869_v39 = vadd.f32 %v1390_v36, %v1851_v43  ;;  %v863_v40 = vpop.f32.mrb[29].mxu1 }
 0x244   :  { %v864_v44 = vadd.f32 %v1851_v43, %v863_v40  ;;  %1447 = vmatprep.subr.bf16.mxu1 %v1446_v38 }
 0x245   :  { %v943_v32 = vsub.f32 %v911_v37, %v869_v39  ;;  %1449 = vmatpush3.bf16.xpose.msra.mxu1 %v1448_v47 }
 0x246   :  { %v942_v33 = vsub.f32 %v910_v41, %v864_v44 }
 0x247   :  { %v975_v34 = vmul.f32 %v943_v32, %v943_v32 }
 0x248   :  { %v974_v48 = vmul.f32 %v942_v33, %v942_v33 }
 0x24a   :  { %v1393_v42 = vpop.f32.mrb[30].mxu1  ;;  %v1450_v50 = vpack.c.bf16 %v975_v34, %v974_v48 }
 0x24b   :  { %v879_v55 = vadd.f32 %v1393_v42, %v1851_v43  ;;  %v873_v56 = vpop.f32.mrb[31].mxu1 }
 0x24c   :  { %v874_v53 = vadd.f32 %v1851_v43, %v873_v56  ;;  %1451 = vmatprep.subr.bf16.mxu1 %v1450_v50  ;;  %v1055_v43 = vlaneseq }
 0x24d   :  { %v945_v45 = vsub.f32 %v913_v49, %v879_v55  ;;  %1453 = vmatpush3.bf16.xpose.msra.mxu1 %v1452_v61 }
 0x24e   :  { %v944_v46 = vsub.f32 %v912_v52, %v874_v53  ;;  %v1056_v3 = vshrl.u32 %v1055_v43, 7  ;;  %vm1069_vm0 = vcmp.lt.s32.totalorder %v1055_v43, 256 }
 0x24f   :  { %v977_v47 = vmul.f32 %v945_v45, %v945_v45 }
 0x250   :  { %v976_v54 = vmul.f32 %v944_v46, %v944_v46  ;;  %v1057_v5 = vsub.s32 %v1054_v2, %v1056_v3 }
 0x252   :  { %v1454_v57 = vpack.c.bf16 %v977_v47, %v976_v54 }
 0x254   :  { %1455 = vmatprep.subr.bf16.mxu1 %v1454_v57 }
 0x255   :  { %1457 = vmatpush3.bf16.xpose.msra.mxu1 %v1456_v14 }
 0x25c   :  { %1313 = vmatmul.mubr.f32.vlgmr.msra.gmra.mrb[32].mxu1 %v1533_v51 }
 0x32f   :  { %v1044_v4 = vpop.f32.mrb[32].mxu1 }
 0x330   :  { %v1046_v59 = vpop.f32.mrb[33].mxu1 }
 0x331   :  { %v1051_v60 = vcombine.low %v1044_v4, %v1046_v59 }
 0x333   :  { %v1058_v61 = vrot.slane %v1051_v60, %v1057_v5 }
 0x335   :  { %v1065_v6 = vrot.slane %v1058_v61, %v1057_v5 }
 0x337   :  { %1071 = vst.msk [vmem:[#allocation3] sm:$0x3] %vm1069_vm0, %v1065_v6 }
 0x338   :  { %1520 = shalt.err (!%p1517_p4)
}
 0x339   :  { %s1521_s19 = scalar_lea.hbm %s2073_s6, 32 }
 0x33a   :  { %p1522_p5 = scmp.ne.s32.totalorder %s2073_s6, %s1521_s19  ;;  %p1525_p6 = scmp.lt.u32.totalorder %s1521_s19, %s2073_s6 }
 0x33c   :  { %p1527_p7 = pnand %p1525_p6, %p1522_p5 }
 0x33e   :  { %1530 = shalt.err (!%p1527_p7)
}
 0x33f   :  { %1081 = dma.vmem_to_hbm [thread:$0]  %s1079_s15, 32, %s2073_s6, [#allocation4]  }
 0x340   :  { %1531 = dma.done.wait [#allocation4], 32  }
 0x341   :  { %1532 = vsyncadd [#allocation4], 4294967264 }
 0x342   :  { %1085 = vsyncpa [#allocation4], 1 }

</bundles_post_ra>
